<compile_context>
chip_gen: v6e
topology: v6e:2x2x1
jax: 0.10.0
libtpu: 0.0.40
codegen_flags: <defaults>
</compile_context>

<pallas_src>
import math

import jax
import jax.numpy as jnp
from jax.experimental import pallas as pl
from jax.experimental.pallas import tpu as pltpu

EPS = 1e-5


# ---------------------------------------------------------------------------
# helpers (traced inside kernels)
# ---------------------------------------------------------------------------
def _gelu(x):
    # TODO(synk): PyTorch F.gelu default is the exact erf GELU; tanh approx
    # used for guaranteed Mosaic lowering (small systematic deviation).
    c = math.sqrt(2.0 / math.pi)
    return 0.5 * x * (1.0 + jnp.tanh(c * (x + 0.044715 * x * x * x)))


def _layernorm(x, g, b):
    mu = jnp.mean(x, axis=-1, keepdims=True)
    var = jnp.mean(jnp.square(x - mu), axis=-1, keepdims=True)
    return (x - mu) * jax.lax.rsqrt(var + EPS) * g + b


def _shift_rows(x, off, S):
    """y[t] = x[t + off] for valid t, else 0. XLU roll + boundary mask."""
    if off == 0:
        return x
    y = pltpu.roll(x, shift=(-off) % S, axis=0)
    t = jax.lax.broadcasted_iota(jnp.int32, x.shape, 0)
    mask = t < (S - off) if off > 0 else t >= (-off)
    return jnp.where(mask, y, 0.0)


def _conv1d_gelu(x_f32, w_ref, bias, K, dil, pad, S):
    """'same' 1-D conv over rows of x (S, Cin) with weight ref (K, Cin, Cout)."""
    # rolls kept in f32 (native 32-bit sublane rotate); cast to bf16 at the MXU.
    cout = w_ref.shape[-1]
    acc = jnp.zeros((S, cout), jnp.float32)
    for k in range(K):                                     # static tap loop
        off = k * dil - pad
        xs = _shift_rows(x_f32, off, S).astype(jnp.bfloat16)
        acc = acc + jnp.dot(xs, w_ref[k], preferred_element_type=jnp.float32)
    return _gelu(acc + bias)


def sinusoids(length, channels, max_timescale=1000):
    assert channels % 2 == 0
    inc = math.log(max_timescale) / (channels // 2 - 1)
    inv = jnp.exp(-inc * jnp.arange(channels // 2, dtype=jnp.float32))
    scaled = jnp.arange(length, dtype=jnp.float32)[:, None] * inv[None, :]
    return jnp.concatenate([jnp.sin(scaled), jnp.cos(scaled)], axis=1)


def _compiler_params(dimension_semantics):
    # Per-generation VMEM provisioning: ~85% of physical so Mosaic internal
    # scratch keeps headroom (≈54 MiB on v7x, ≈109 MiB on v5e/v6e).
    try:
        cap = int(pltpu.get_tpu_info().vmem_capacity_bytes)
    except Exception:
        cap = 64 << 20
    limit = max(int(cap * 0.85), 32 << 20)
    return pltpu.CompilerParams(dimension_semantics=dimension_semantics,
                                vmem_limit_bytes=limit)


def _pick_kv_chunk(S, target=512):
    """Largest divisor of S (<= target, preferring mult. of 128/8) for flash tiling."""
    if S <= target:
        return S
    for step in (128, 8):
        for c in range(target - (target % step), step - 1, -step):
            if c > 0 and S % c == 0:
                return c
    return S


# ---------------------------------------------------------------------------
# kernel 1: fused stem — pre_norm + encoder_proj + conv1+GELU + conv2+GELU + pos
# ---------------------------------------------------------------------------
def _make_stem_kernel(S, conv1_cfg, conv2_cfg):
    K1, d1, p1 = conv1_cfg
    K2, d2, p2 = conv2_cfg

    def kernel(x_ref, g_ref, b_ref, pw_ref, pb_ref,
               c1w_ref, c1b_ref, c2w_ref, c2b_ref, pos_ref, o_ref):
        x = x_ref[...].astype(jnp.float32)                       # (S, C)
        xn = _layernorm(x, g_ref[0], b_ref[0])
        h = jnp.dot(xn.astype(jnp.bfloat16), pw_ref[...],
                    preferred_element_type=jnp.float32) + pb_ref[0]
        h = _conv1d_gelu(h, c1w_ref, c1b_ref[0], K1, d1, p1, S)
        h = _conv1d_gelu(h, c2w_ref, c2b_ref[0], K2, d2, p2, S)
        o_ref[...] = (h + pos_ref[...]).astype(o_ref.dtype)

    return kernel


def _stem_impl(eeg, p, conv1_cfg, conv2_cfg, single_buffer):
    B, S, C = eeg.shape
    D = p["conv1_w"].shape[-1]
    for K, d, pad in (conv1_cfg, conv2_cfg):
        assert 2 * pad == d * (K - 1), "padding/dilation must preserve length"

    operands = (eeg, p["pre_g"], p["pre_b"], p["proj_w"], p["proj_b"],
                p["conv1_w"], p["conv1_b"], p["conv2_w"], p["conv2_b"], p["pos"])

    def const_spec(a):
        idx = lambda i, n=a.ndim: (0,) * n
        if single_buffer:
            # block index never changes -> single-buffer (halves weight VMEM)
            return pl.BlockSpec(a.shape, idx, pipeline_mode=pl.Buffered(1))
        return pl.BlockSpec(a.shape, idx)

    in_specs = [pl.BlockSpec((None, S, C), lambda i: (i, 0, 0))]
    in_specs += [const_spec(a) for a in operands[1:]]

    return pl.pallas_call(
        _make_stem_kernel(S, conv1_cfg, conv2_cfg),
        grid=(B,),
        in_specs=in_specs,
        out_specs=pl.BlockSpec((None, S, D), lambda i: (i, 0, 0)),
        out_shape=jax.ShapeDtypeStruct((B, S, D), eeg.dtype),
        compiler_params=_compiler_params(("parallel",)),
    )(*operands)


def encoder_stem(eeg, p, conv1_cfg=(3, 1, 1), conv2_cfg=(3, 2, 2)):
    try:
        return _stem_impl(eeg, p, conv1_cfg, conv2_cfg, single_buffer=True)
    except Exception:
        # pl.Buffered(1) / pipeline_mode unsupported on this jax version.
        return _stem_impl(eeg, p, conv1_cfg, conv2_cfg, single_buffer=False)


# ---------------------------------------------------------------------------
# kernel 2: ALL AttentionEncoderBlocks fused — grid=(B, n_layers)
#   x = x + MHA(LN1(x)); x = x + MLP(LN2(x))   (non-causal, dropout = 0)
# residual stream lives in VMEM scratch; output written only on the last layer.
# ---------------------------------------------------------------------------
def _make_encoder_kernel(n_heads, n_layers, kv_chunk):
    def kernel(x_ref,
               ln1g_ref, ln1b_ref, wq_ref, bq_ref, wk_ref, bk_ref,
               wv_ref, bv_ref, wo_ref, bo_ref, ln2g_ref, ln2b_ref,
               w1_ref, b1_ref, w2_ref, b2_ref,
               o_ref, res_ref):
        lyr = pl.program_id(1)

        @pl.when(lyr == 0)
        def _():
            res_ref[...] = x_ref[...].astype(jnp.float32)

        x = res_ref[...]                                          # (S, D) f32
        S, D = x.shape

        # ---- attention (pre-LN, residual) ----
        h = _layernorm(x, ln1g_ref[0], ln1b_ref[0]).astype(jnp.bfloat16)

        def head_body(hh, attn):
            # 1/sqrt(hd) already folded into wq/bq host-side.
            qh = (jnp.dot(h, wq_ref[hh], preferred_element_type=jnp.float32)
                  + bq_ref[hh]).astype(jnp.bfloat16)
            kh = (jnp.dot(h, wk_ref[hh], preferred_element_type=jnp.float32)
                  + bk_ref[hh]).astype(jnp.bfloat16)
            vh = (jnp.dot(h, wv_ref[hh], preferred_element_type=jnp.float32)
                  + bv_ref[hh]).astype(jnp.bfloat16)

            if kv_chunk >= S:
                # full softmax (demo / small S) with deferred normalization
                s = jax.lax.dot_general(qh, kh, (((1,), (1,)), ((), ())),
                                        preferred_element_type=jnp.float32)
                m = jnp.max(s, axis=-1, keepdims=True)
                p = jnp.exp(s - m)
                denom = jnp.sum(p, axis=-1, keepdims=True)
                ctx = jnp.dot(p.astype(jnp.bfloat16), vh,
                              preferred_element_type=jnp.float32)
            else:
                # flash-style KV streaming: live scores bounded to (S, kv_chunk)
                def kv_body(c, carry):
                    m_i, l_i, acc = carry
                    kc = jax.lax.dynamic_slice_in_dim(kh, c * kv_chunk, kv_chunk, 0)
                    vc = jax.lax.dynamic_slice_in_dim(vh, c * kv_chunk, kv_chunk, 0)
                    sc = jax.lax.dot_general(qh, kc, (((1,), (1,)), ((), ())),
                                             preferred_element_type=jnp.float32)
                    m_new = jnp.maximum(m_i, jnp.max(sc, axis=-1, keepdims=True))
                    alpha = jnp.exp(m_i - m_new)
                    pc = jnp.exp(sc - m_new)
                    l_new = alpha * l_i + jnp.sum(pc, axis=-1, keepdims=True)
                    acc_new = alpha * acc + jnp.dot(
                        pc.astype(jnp.bfloat16), vc,
                        preferred_element_type=jnp.float32)
                    return m_new, l_new, acc_new

                init = (jnp.full((S, 1), -jnp.inf, jnp.float32),
                        jnp.zeros((S, 1), jnp.float32),
                        jnp.zeros((S, vh.shape[-1]), jnp.float32))
                _, denom, ctx = jax.lax.fori_loop(0, S // kv_chunk, kv_body, init)

            # deferred softmax normalization: scale (S, hd) once (EUP recip)
            ctx = ctx * pl.reciprocal(denom, approx=True)
            return attn + jnp.dot(ctx.astype(jnp.bfloat16), wo_ref[hh],
                                  preferred_element_type=jnp.float32)

        attn = jax.lax.fori_loop(0, n_heads, head_body,
                                 jnp.zeros((S, D), jnp.float32))
        x = x + attn + bo_ref[0]

        # ---- MLP (pre-LN, residual) ----
        h2 = _layernorm(x, ln2g_ref[0], ln2b_ref[0]).astype(jnp.bfloat16)
        m1 = _gelu(jnp.dot(h2, w1_ref[...], preferred_element_type=jnp.float32)
                   + b1_ref[0]).astype(jnp.bfloat16)
        x = x + jnp.dot(m1, w2_ref[...],
                        preferred_element_type=jnp.float32) + b2_ref[0]

        res_ref[...] = x

        @pl.when(lyr == n_layers - 1)
        def _():
            o_ref[...] = x.astype(o_ref.dtype)

    return kernel


def encoder_blocks(x, stacked, n_heads, n_layers):
    B, S, D = x.shape
    kv_chunk = _pick_kv_chunk(S)

    def layer_spec(a):
        n = a.ndim
        return pl.BlockSpec((None,) + a.shape[1:],
                            lambda b, l, n=n: (l,) + (0,) * (n - 1))

    in_specs = [pl.BlockSpec((None, S, D), lambda b, l: (b, 0, 0))]
    in_specs += [layer_spec(a) for a in stacked]

    return pl.pallas_call(
        _make_encoder_kernel(n_heads, n_layers, kv_chunk),
        grid=(B, n_layers),
        in_specs=in_specs,
        out_specs=pl.BlockSpec((None, S, D), lambda b, l: (b, 0, 0)),
        out_shape=jax.ShapeDtypeStruct((B, S, D), x.dtype),
        scratch_shapes=[pltpu.VMEM((S, D), jnp.float32)],
        compiler_params=_compiler_params(("parallel", "arbitrary")),
    )(x, *stacked)


# ---------------------------------------------------------------------------
# parameter init (deterministic, synthetic; PyTorch-like layout) + preparation
# ---------------------------------------------------------------------------
def init_params(key, C, S, D, n_layers):
    keys = iter(jax.random.split(key, 8 + 6 * n_layers))

    def w(shape, scale=0.02):
        return scale * jax.random.normal(next(keys), shape, jnp.float32)

    params = {
        "pre_g": jnp.ones((1, C), jnp.float32),
        "pre_b": jnp.zeros((1, C), jnp.float32),
        "proj_w": w((C, C)),
        "proj_b": jnp.zeros((1, C), jnp.float32),
        "conv1_w": w((3, C, D)),
        "conv1_b": jnp.zeros((1, D), jnp.float32),
        "conv2_w": w((3, D, D)),
        "conv2_b": jnp.zeros((1, D), jnp.float32),
        "pos": sinusoids(S, D),
        "blocks": [],
    }
    for _ in range(n_layers):
        params["blocks"].append(dict(
            ln1_g=jnp.ones((1, D), jnp.float32), ln1_b=jnp.zeros((1, D), jnp.float32),
            wqkv=w((D, 3 * D)), bqkv=jnp.zeros((1, 3 * D), jnp.float32),
            wo=w((D, D)), bo=jnp.zeros((1, D), jnp.float32),
            ln2_g=jnp.ones((1, D), jnp.float32), ln2_b=jnp.zeros((1, D), jnp.float32),
            w1=w((D, 4 * D)), b1=jnp.zeros((1, 4 * D), jnp.float32),
            w2=w((4 * D, D)), b2=jnp.zeros((1, D), jnp.float32),
        ))
    return params


def prepare_params(raw, n_heads):
    """Host-side prep: bf16 matmul weights, per-head attention layout,
    1/sqrt(hd) folded into q projection, per-layer weights stacked on a
    leading layer axis for the fused (B, n_layers) grid."""
    D = raw["conv1_w"].shape[-1]
    assert D % n_heads == 0, "d_model must be divisible by n_heads"
    hd = D // n_heads
    scale = 1.0 / math.sqrt(hd)
    bf16 = lambda a: a.astype(jnp.bfloat16)

    def split_heads_cols(wcol):                       # (D, D) -> (H, D, hd)
        return jnp.transpose(wcol.reshape(D, n_heads, hd), (1, 0, 2))

    out = {
        "pre_g": raw["pre_g"], "pre_b": raw["pre_b"],
        "proj_w": bf16(raw["proj_w"]), "proj_b": raw["proj_b"],
        "conv1_w": bf16(raw["conv1_w"]), "conv1_b": raw["conv1_b"],
        "conv2_w": bf16(raw["conv2_w"]), "conv2_b": raw["conv2_b"],
        "pos": raw["pos"],
    }

    per_layer = []
    for b in raw["blocks"]:
        wqkv, bqkv = b["wqkv"], b["bqkv"][0]
        wq = split_heads_cols(wqkv[:, :D]) * scale
        wk = split_heads_cols(wqkv[:, D:2 * D])
        wv = split_heads_cols(wqkv[:, 2 * D:])
        bq = bqkv[:D].reshape(n_heads, 1, hd) * scale
        bk = bqkv[D:2 * D].reshape(n_heads, 1, hd)
        bv = bqkv[2 * D:].reshape(n_heads, 1, hd)
        wo = b["wo"].reshape(n_heads, hd, D)
        per_layer.append((
            b["ln1_g"], b["ln1_b"],
            bf16(wq), bq, bf16(wk), bk, bf16(wv), bv,
            bf16(wo), b["bo"],
            b["ln2_g"], b["ln2_b"],
            bf16(b["w1"]), b["b1"], bf16(b["w2"]), b["b2"],
        ))
    n_fields = len(per_layer[0])
    out["blocks"] = tuple(jnp.stack([lyr[i] for lyr in per_layer], axis=0)
                          for i in range(n_fields))
    out["n_layers"] = len(per_layer)
    return out


# ---------------------------------------------------------------------------
# full forward
# ---------------------------------------------------------------------------
def telepath_forward(params, eeg, input_ids, n_heads):
    """eeg: (B, n_samples, n_channels); input_ids: (B, n_tokens) (unused)."""
    del input_ids  # TODO(synk): ExpertGPT decoder not provided; encoder output returned.
    x = encoder_stem(eeg, params)
    x = encoder_blocks(x, params["blocks"], n_heads, params["n_layers"])
    # ln_post intentionally not applied (matches reference forward).
    return x


if __name__ == "__main__":
    B, S, C_IN, D_MODEL, N_HEADS, N_LAYERS = 2, 16, 4, 32, 4, 2

    key = jax.random.PRNGKey(0)
    k_eeg, k_params = jax.random.split(key)
    eeg = jax.random.normal(k_eeg, (B, S, C_IN), jnp.float32)
    input_ids = jnp.zeros((B, 8), jnp.int32)

    raw_params = init_params(k_params, C_IN, S, D_MODEL, N_LAYERS)
    params = prepare_params(raw_params, N_HEADS)

    out = telepath_forward(params, eeg, input_ids, N_HEADS)
    out = jax.block_until_ready(out)
    assert out.shape == (B, S, D_MODEL)
    print("KERNEL_OK")
</pallas_src>

<mosaic_0001>
module attributes {stable_mosaic.version = 11 : i64} {
  func.func @kernel(%arg0: i32, %arg1: memref<1x16x4xf32, #tpu.memory_space<vmem>>, %arg2: memref<1x4xf32, #tpu.memory_space<vmem>>, %arg3: memref<1x4xf32, #tpu.memory_space<vmem>>, %arg4: memref<4x4xbf16, #tpu.memory_space<vmem>>, %arg5: memref<1x4xf32, #tpu.memory_space<vmem>>, %arg6: memref<3x4x32xbf16, #tpu.memory_space<vmem>>, %arg7: memref<1x32xf32, #tpu.memory_space<vmem>>, %arg8: memref<3x32x32xbf16, #tpu.memory_space<vmem>>, %arg9: memref<1x32xf32, #tpu.memory_space<vmem>>, %arg10: memref<16x32xf32, #tpu.memory_space<vmem>>, %arg11: memref<1x16x32xf32, #tpu.memory_space<vmem>>) attributes {dimension_semantics = [#tpu.dimension_semantics<parallel>], iteration_bounds = array<i64: 2>, scalar_prefetch = 0 : i64, scratch_operands = 0 : i64, tpu.core_type = #tpu.core_type<tc>, window_params = [{transform_indices = @transform_0, window_bounds = array<i64: 1, 16, 4>}, {pipeline_mode = #tpu.pipeline_mode<synchronous>, transform_indices = @transform_1, window_bounds = array<i64: 1, 4>}, {pipeline_mode = #tpu.pipeline_mode<synchronous>, transform_indices = @transform_2, window_bounds = array<i64: 1, 4>}, {pipeline_mode = #tpu.pipeline_mode<synchronous>, transform_indices = @transform_3, window_bounds = array<i64: 4, 4>}, {pipeline_mode = #tpu.pipeline_mode<synchronous>, transform_indices = @transform_4, window_bounds = array<i64: 1, 4>}, {pipeline_mode = #tpu.pipeline_mode<synchronous>, transform_indices = @transform_5, window_bounds = array<i64: 3, 4, 32>}, {pipeline_mode = #tpu.pipeline_mode<synchronous>, transform_indices = @transform_6, window_bounds = array<i64: 1, 32>}, {pipeline_mode = #tpu.pipeline_mode<synchronous>, transform_indices = @transform_7, window_bounds = array<i64: 3, 32, 32>}, {pipeline_mode = #tpu.pipeline_mode<synchronous>, transform_indices = @transform_8, window_bounds = array<i64: 1, 32>}, {pipeline_mode = #tpu.pipeline_mode<synchronous>, transform_indices = @transform_9, window_bounds = array<i64: 16, 32>}, {transform_indices = @transform_10, window_bounds = array<i64: 1, 16, 32>}]} {
    %c0 = arith.constant 0 : index
    %c0_0 = arith.constant 0 : index
    %c0_1 = arith.constant 0 : index
    %0 = vector.load %arg1[%c0, %c0_0, %c0_1] : memref<1x16x4xf32, #tpu.memory_space<vmem>>, vector<1x16x4xf32>
    %1 = vector.shape_cast %0 : vector<1x16x4xf32> to vector<16x4xf32>
    %c0_2 = arith.constant 0 : index
    %c0_3 = arith.constant 0 : index
    %2 = vector.load %arg2[%c0_2, %c0_3] : memref<1x4xf32, #tpu.memory_space<vmem>>, vector<1x4xf32>
    %3 = vector.shape_cast %2 : vector<1x4xf32> to vector<4xf32>
    %c0_4 = arith.constant 0 : index
    %c0_5 = arith.constant 0 : index
    %4 = vector.load %arg3[%c0_4, %c0_5] : memref<1x4xf32, #tpu.memory_space<vmem>>, vector<1x4xf32>
    %5 = vector.shape_cast %4 : vector<1x4xf32> to vector<4xf32>
    %cst = arith.constant dense<0.000000e+00> : vector<16xf32>
    %6 = vector.multi_reduction <add>, %1, %cst [1] : vector<16x4xf32> to vector<16xf32>
    %7 = vector.shape_cast %6 : vector<16xf32> to vector<16x1xf32>
    %cst_6 = arith.constant 4.000000e+00 : f32
    %8 = vector.broadcast %cst_6 : f32 to vector<16x1xf32>
    %9 = arith.divf %7, %8 : vector<16x1xf32>
    %10 = vector.broadcast %9 : vector<16x1xf32> to vector<16x4xf32>
    %11 = arith.subf %1, %10 : vector<16x4xf32>
    %12 = arith.mulf %11, %11 : vector<16x4xf32>
    %cst_7 = arith.constant dense<0.000000e+00> : vector<16xf32>
    %13 = vector.multi_reduction <add>, %12, %cst_7 [1] : vector<16x4xf32> to vector<16xf32>
    %14 = vector.shape_cast %13 : vector<16xf32> to vector<16x1xf32>
    %cst_8 = arith.constant 4.000000e+00 : f32
    %15 = vector.broadcast %cst_8 : f32 to vector<16x1xf32>
    %16 = arith.divf %14, %15 : vector<16x1xf32>
    %17 = vector.broadcast %9 : vector<16x1xf32> to vector<16x4xf32>
    %18 = arith.subf %1, %17 : vector<16x4xf32>
    %cst_9 = arith.constant 9.99999974E-6 : f32
    %19 = vector.broadcast %cst_9 : f32 to vector<16x1xf32>
    %20 = arith.addf %16, %19 : vector<16x1xf32>
    %21 = math.rsqrt %20 : vector<16x1xf32>
    %22 = vector.broadcast %21 : vector<16x1xf32> to vector<16x4xf32>
    %23 = arith.mulf %18, %22 : vector<16x4xf32>
    %24 = vector.shape_cast %3 : vector<4xf32> to vector<1x4xf32>
    %25 = vector.broadcast %24 : vector<1x4xf32> to vector<16x4xf32>
    %26 = arith.mulf %23, %25 : vector<16x4xf32>
    %27 = vector.shape_cast %5 : vector<4xf32> to vector<1x4xf32>
    %28 = vector.broadcast %27 : vector<1x4xf32> to vector<16x4xf32>
    %29 = arith.addf %26, %28 : vector<16x4xf32>
    %30 = arith.truncf %29 : vector<16x4xf32> to vector<16x4xbf16>
    %c0_10 = arith.constant 0 : index
    %c0_11 = arith.constant 0 : index
    %31 = vector.load %arg4[%c0_10, %c0_11] : memref<4x4xbf16, #tpu.memory_space<vmem>>, vector<4x4xbf16>
    %cst_12 = arith.constant dense<0.000000e+00> : vector<16x4xf32>
    %32 = tpu.matmul %30, %31, %cst_12 {dimension_numbers = #tpu.dot_dimension_numbers<[1], [0], [0], [1], [0, 0, 1, 1], [], []>} : vector<16x4xbf16>, vector<4x4xbf16>, vector<16x4xf32> -> vector<16x4xf32>
    %c0_13 = arith.constant 0 : index
    %c0_14 = arith.constant 0 : index
    %33 = vector.load %arg5[%c0_13, %c0_14] : memref<1x4xf32, #tpu.memory_space<vmem>>, vector<1x4xf32>
    %34 = vector.shape_cast %33 : vector<1x4xf32> to vector<4xf32>
    %35 = vector.shape_cast %34 : vector<4xf32> to vector<1x4xf32>
    %36 = vector.broadcast %35 : vector<1x4xf32> to vector<16x4xf32>
    %37 = arith.addf %32, %36 : vector<16x4xf32>
    %c0_15 = arith.constant 0 : index
    %c0_16 = arith.constant 0 : index
    %38 = vector.load %arg7[%c0_15, %c0_16] : memref<1x32xf32, #tpu.memory_space<vmem>>, vector<1x32xf32>
    %39 = vector.shape_cast %38 : vector<1x32xf32> to vector<32xf32>
    %cst_17 = arith.constant 0.000000e+00 : f32
    %40 = vector.broadcast %cst_17 : f32 to vector<16x32xf32>
    %c1_i32 = arith.constant 1 : i32
    %41 = tpu.dynamic_rotate %37 by %c1_i32 dim 0 : vector<16x4xf32>, i32 -> vector<16x4xf32>
    %42 = tpu.iota {dimensions = array<i32: 0>} : vector<16x4xi32>
    %c1_i32_18 = arith.constant 1 : i32
    %43 = vector.broadcast %c1_i32_18 : i32 to vector<16x4xi32>
    %44 = arith.cmpi sge, %42, %43 : vector<16x4xi32>
    %cst_19 = arith.constant 0.000000e+00 : f32
    %45 = vector.broadcast %cst_19 : f32 to vector<16x4xf32>
    %46 = arith.select %44, %41, %45 : vector<16x4xi1>, vector<16x4xf32>
    %47 = arith.truncf %46 : vector<16x4xf32> to vector<16x4xbf16>
    %c0_20 = arith.constant 0 : index
    %c0_21 = arith.constant 0 : index
    %c0_22 = arith.constant 0 : index
    %48 = vector.load %arg6[%c0_20, %c0_21, %c0_22] : memref<3x4x32xbf16, #tpu.memory_space<vmem>>, vector<1x4x32xbf16>
    %49 = vector.shape_cast %48 : vector<1x4x32xbf16> to vector<4x32xbf16>
    %cst_23 = arith.constant dense<0.000000e+00> : vector<16x32xf32>
    %50 = tpu.matmul %47, %49, %cst_23 {dimension_numbers = #tpu.dot_dimension_numbers<[1], [0], [0], [1], [0, 0, 1, 1], [], []>} : vector<16x4xbf16>, vector<4x32xbf16>, vector<16x32xf32> -> vector<16x32xf32>
    %51 = arith.addf %40, %50 : vector<16x32xf32>
    %52 = arith.truncf %37 : vector<16x4xf32> to vector<16x4xbf16>
    %c1 = arith.constant 1 : index
    %c0_24 = arith.constant 0 : index
    %c0_25 = arith.constant 0 : index
    %53 = vector.load %arg6[%c1, %c0_24, %c0_25] : memref<3x4x32xbf16, #tpu.memory_space<vmem>>, vector<1x4x32xbf16>
    %54 = vector.shape_cast %53 : vector<1x4x32xbf16> to vector<4x32xbf16>
    %cst_26 = arith.constant dense<0.000000e+00> : vector<16x32xf32>
    %55 = tpu.matmul %52, %54, %cst_26 {dimension_numbers = #tpu.dot_dimension_numbers<[1], [0], [0], [1], [0, 0, 1, 1], [], []>} : vector<16x4xbf16>, vector<4x32xbf16>, vector<16x32xf32> -> vector<16x32xf32>
    %56 = arith.addf %51, %55 : vector<16x32xf32>
    %c15_i32 = arith.constant 15 : i32
    %57 = tpu.dynamic_rotate %37 by %c15_i32 dim 0 : vector<16x4xf32>, i32 -> vector<16x4xf32>
    %58 = tpu.iota {dimensions = array<i32: 0>} : vector<16x4xi32>
    %c15_i32_27 = arith.constant 15 : i32
    %59 = vector.broadcast %c15_i32_27 : i32 to vector<16x4xi32>
    %60 = arith.cmpi slt, %58, %59 : vector<16x4xi32>
    %cst_28 = arith.constant 0.000000e+00 : f32
    %61 = vector.broadcast %cst_28 : f32 to vector<16x4xf32>
    %62 = arith.select %60, %57, %61 : vector<16x4xi1>, vector<16x4xf32>
    %63 = arith.truncf %62 : vector<16x4xf32> to vector<16x4xbf16>
    %c2 = arith.constant 2 : index
    %c0_29 = arith.constant 0 : index
    %c0_30 = arith.constant 0 : index
    %64 = vector.load %arg6[%c2, %c0_29, %c0_30] : memref<3x4x32xbf16, #tpu.memory_space<vmem>>, vector<1x4x32xbf16>
    %65 = vector.shape_cast %64 : vector<1x4x32xbf16> to vector<4x32xbf16>
    %cst_31 = arith.constant dense<0.000000e+00> : vector<16x32xf32>
    %66 = tpu.matmul %63, %65, %cst_31 {dimension_numbers = #tpu.dot_dimension_numbers<[1], [0], [0], [1], [0, 0, 1, 1], [], []>} : vector<16x4xbf16>, vector<4x32xbf16>, vector<16x32xf32> -> vector<16x32xf32>
    %67 = arith.addf %56, %66 : vector<16x32xf32>
    %68 = vector.shape_cast %39 : vector<32xf32> to vector<1x32xf32>
    %69 = vector.broadcast %68 : vector<1x32xf32> to vector<16x32xf32>
    %70 = arith.addf %67, %69 : vector<16x32xf32>
    %cst_32 = arith.constant 5.000000e-01 : f32
    %71 = vector.broadcast %cst_32 : f32 to vector<16x32xf32>
    %72 = arith.mulf %71, %70 : vector<16x32xf32>
    %cst_33 = arith.constant 4.471500e-02 : f32
    %73 = vector.broadcast %cst_33 : f32 to vector<16x32xf32>
    %74 = arith.mulf %73, %70 : vector<16x32xf32>
    %75 = arith.mulf %74, %70 : vector<16x32xf32>
    %76 = arith.mulf %75, %70 : vector<16x32xf32>
    %77 = arith.addf %70, %76 : vector<16x32xf32>
    %cst_34 = arith.constant 0.797884583 : f32
    %78 = vector.broadcast %cst_34 : f32 to vector<16x32xf32>
    %79 = arith.mulf %78, %77 : vector<16x32xf32>
    %80 = math.tanh %79 : vector<16x32xf32>
    %cst_35 = arith.constant 1.000000e+00 : f32
    %81 = vector.broadcast %cst_35 : f32 to vector<16x32xf32>
    %82 = arith.addf %81, %80 : vector<16x32xf32>
    %83 = arith.mulf %72, %82 : vector<16x32xf32>
    %c0_36 = arith.constant 0 : index
    %c0_37 = arith.constant 0 : index
    %84 = vector.load %arg9[%c0_36, %c0_37] : memref<1x32xf32, #tpu.memory_space<vmem>>, vector<1x32xf32>
    %85 = vector.shape_cast %84 : vector<1x32xf32> to vector<32xf32>
    %cst_38 = arith.constant 0.000000e+00 : f32
    %86 = vector.broadcast %cst_38 : f32 to vector<16x32xf32>
    %c2_i32 = arith.constant 2 : i32
    %87 = tpu.dynamic_rotate %83 by %c2_i32 dim 0 : vector<16x32xf32>, i32 -> vector<16x32xf32>
    %88 = tpu.iota {dimensions = array<i32: 0>} : vector<16x32xi32>
    %c2_i32_39 = arith.constant 2 : i32
    %89 = vector.broadcast %c2_i32_39 : i32 to vector<16x32xi32>
    %90 = arith.cmpi sge, %88, %89 : vector<16x32xi32>
    %cst_40 = arith.constant 0.000000e+00 : f32
    %91 = vector.broadcast %cst_40 : f32 to vector<16x32xf32>
    %92 = arith.select %90, %87, %91 : vector<16x32xi1>, vector<16x32xf32>
    %93 = arith.truncf %92 : vector<16x32xf32> to vector<16x32xbf16>
    %c0_41 = arith.constant 0 : index
    %c0_42 = arith.constant 0 : index
    %c0_43 = arith.constant 0 : index
    %94 = vector.load %arg8[%c0_41, %c0_42, %c0_43] : memref<3x32x32xbf16, #tpu.memory_space<vmem>>, vector<1x32x32xbf16>
    %95 = vector.shape_cast %94 : vector<1x32x32xbf16> to vector<32x32xbf16>
    %cst_44 = arith.constant dense<0.000000e+00> : vector<16x32xf32>
    %96 = tpu.matmul %93, %95, %cst_44 {dimension_numbers = #tpu.dot_dimension_numbers<[1], [0], [0], [1], [0, 0, 1, 1], [], []>} : vector<16x32xbf16>, vector<32x32xbf16>, vector<16x32xf32> -> vector<16x32xf32>
    %97 = arith.addf %86, %96 : vector<16x32xf32>
    %98 = arith.truncf %83 : vector<16x32xf32> to vector<16x32xbf16>
    %c1_45 = arith.constant 1 : index
    %c0_46 = arith.constant 0 : index
    %c0_47 = arith.constant 0 : index
    %99 = vector.load %arg8[%c1_45, %c0_46, %c0_47] : memref<3x32x32xbf16, #tpu.memory_space<vmem>>, vector<1x32x32xbf16>
    %100 = vector.shape_cast %99 : vector<1x32x32xbf16> to vector<32x32xbf16>
    %cst_48 = arith.constant dense<0.000000e+00> : vector<16x32xf32>
    %101 = tpu.matmul %98, %100, %cst_48 {dimension_numbers = #tpu.dot_dimension_numbers<[1], [0], [0], [1], [0, 0, 1, 1], [], []>} : vector<16x32xbf16>, vector<32x32xbf16>, vector<16x32xf32> -> vector<16x32xf32>
    %102 = arith.addf %97, %101 : vector<16x32xf32>
    %c14_i32 = arith.constant 14 : i32
    %103 = tpu.dynamic_rotate %83 by %c14_i32 dim 0 : vector<16x32xf32>, i32 -> vector<16x32xf32>
    %104 = tpu.iota {dimensions = array<i32: 0>} : vector<16x32xi32>
    %c14_i32_49 = arith.constant 14 : i32
    %105 = vector.broadcast %c14_i32_49 : i32 to vector<16x32xi32>
    %106 = arith.cmpi slt, %104, %105 : vector<16x32xi32>
    %cst_50 = arith.constant 0.000000e+00 : f32
    %107 = vector.broadcast %cst_50 : f32 to vector<16x32xf32>
    %108 = arith.select %106, %103, %107 : vector<16x32xi1>, vector<16x32xf32>
    %109 = arith.truncf %108 : vector<16x32xf32> to vector<16x32xbf16>
    %c2_51 = arith.constant 2 : index
    %c0_52 = arith.constant 0 : index
    %c0_53 = arith.constant 0 : index
    %110 = vector.load %arg8[%c2_51, %c0_52, %c0_53] : memref<3x32x32xbf16, #tpu.memory_space<vmem>>, vector<1x32x32xbf16>
    %111 = vector.shape_cast %110 : vector<1x32x32xbf16> to vector<32x32xbf16>
    %cst_54 = arith.constant dense<0.000000e+00> : vector<16x32xf32>
    %112 = tpu.matmul %109, %111, %cst_54 {dimension_numbers = #tpu.dot_dimension_numbers<[1], [0], [0], [1], [0, 0, 1, 1], [], []>} : vector<16x32xbf16>, vector<32x32xbf16>, vector<16x32xf32> -> vector<16x32xf32>
    %113 = arith.addf %102, %112 : vector<16x32xf32>
    %114 = vector.shape_cast %85 : vector<32xf32> to vector<1x32xf32>
    %115 = vector.broadcast %114 : vector<1x32xf32> to vector<16x32xf32>
    %116 = arith.addf %113, %115 : vector<16x32xf32>
    %cst_55 = arith.constant 5.000000e-01 : f32
    %117 = vector.broadcast %cst_55 : f32 to vector<16x32xf32>
    %118 = arith.mulf %117, %116 : vector<16x32xf32>
    %cst_56 = arith.constant 4.471500e-02 : f32
    %119 = vector.broadcast %cst_56 : f32 to vector<16x32xf32>
    %120 = arith.mulf %119, %116 : vector<16x32xf32>
    %121 = arith.mulf %120, %116 : vector<16x32xf32>
    %122 = arith.mulf %121, %116 : vector<16x32xf32>
    %123 = arith.addf %116, %122 : vector<16x32xf32>
    %cst_57 = arith.constant 0.797884583 : f32
    %124 = vector.broadcast %cst_57 : f32 to vector<16x32xf32>
    %125 = arith.mulf %124, %123 : vector<16x32xf32>
    %126 = math.tanh %125 : vector<16x32xf32>
    %cst_58 = arith.constant 1.000000e+00 : f32
    %127 = vector.broadcast %cst_58 : f32 to vector<16x32xf32>
    %128 = arith.addf %127, %126 : vector<16x32xf32>
    %129 = arith.mulf %118, %128 : vector<16x32xf32>
    %c0_59 = arith.constant 0 : index
    %c0_60 = arith.constant 0 : index
    %130 = vector.load %arg10[%c0_59, %c0_60] : memref<16x32xf32, #tpu.memory_space<vmem>>, vector<16x32xf32>
    %131 = arith.addf %129, %130 : vector<16x32xf32>
    %c0_61 = arith.constant 0 : index
    %c0_62 = arith.constant 0 : index
    %c0_63 = arith.constant 0 : index
    %132 = vector.load %arg11[%c0_61, %c0_62, %c0_63] : memref<1x16x32xf32, #tpu.memory_space<vmem>>, vector<1x16x32xf32>
    %133 = vector.shape_cast %132 : vector<1x16x32xf32> to vector<16x32xf32>
    %134 = vector.shape_cast %131 : vector<16x32xf32> to vector<1x16x32xf32>
    tpu.vector_store %arg11[%c0_61, %c0_62, %c0_63], %134 {strides = array<i32>} : memref<1x16x32xf32, #tpu.memory_space<vmem>>, vector<1x16x32xf32>,
    return
  }
  func.func @transform_0(%arg0: i32) -> (i32, i32, i32) {
    %c0_i32 = arith.constant 0 : i32
    %c0_i32_0 = arith.constant 0 : i32
    %c0_i32_1 = arith.constant 0 : i32
    return %arg0, %c0_i32, %c0_i32_0 : i32, i32, i32
  }
  func.func @transform_1(%arg0: i32) -> (i32, i32) {
    %c0_i32 = arith.constant 0 : i32
    %c0_i32_0 = arith.constant 0 : i32
    %c0_i32_1 = arith.constant 0 : i32
    return %c0_i32, %c0_i32_0 : i32, i32
  }
  func.func @transform_2(%arg0: i32) -> (i32, i32) {
    %c0_i32 = arith.constant 0 : i32
    %c0_i32_0 = arith.constant 0 : i32
    %c0_i32_1 = arith.constant 0 : i32
    return %c0_i32, %c0_i32_0 : i32, i32
  }
  func.func @transform_3(%arg0: i32) -> (i32, i32) {
    %c0_i32 = arith.constant 0 : i32
    %c0_i32_0 = arith.constant 0 : i32
    %c0_i32_1 = arith.constant 0 : i32
    return %c0_i32, %c0_i32_0 : i32, i32
  }
  func.func @transform_4(%arg0: i32) -> (i32, i32) {
    %c0_i32 = arith.constant 0 : i32
    %c0_i32_0 = arith.constant 0 : i32
    %c0_i32_1 = arith.constant 0 : i32
    return %c0_i32, %c0_i32_0 : i32, i32
  }
  func.func @transform_5(%arg0: i32) -> (i32, i32, i32) {
    %c0_i32 = arith.constant 0 : i32
    %c0_i32_0 = arith.constant 0 : i32
    %c0_i32_1 = arith.constant 0 : i32
    %c0_i32_2 = arith.constant 0 : i32
    return %c0_i32, %c0_i32_0, %c0_i32_1 : i32, i32, i32
  }
  func.func @transform_6(%arg0: i32) -> (i32, i32) {
    %c0_i32 = arith.constant 0 : i32
    %c0_i32_0 = arith.constant 0 : i32
    %c0_i32_1 = arith.constant 0 : i32
    return %c0_i32, %c0_i32_0 : i32, i32
  }
  func.func @transform_7(%arg0: i32) -> (i32, i32, i32) {
    %c0_i32 = arith.constant 0 : i32
    %c0_i32_0 = arith.constant 0 : i32
    %c0_i32_1 = arith.constant 0 : i32
    %c0_i32_2 = arith.constant 0 : i32
    return %c0_i32, %c0_i32_0, %c0_i32_1 : i32, i32, i32
  }
  func.func @transform_8(%arg0: i32) -> (i32, i32) {
    %c0_i32 = arith.constant 0 : i32
    %c0_i32_0 = arith.constant 0 : i32
    %c0_i32_1 = arith.constant 0 : i32
    return %c0_i32, %c0_i32_0 : i32, i32
  }
  func.func @transform_9(%arg0: i32) -> (i32, i32) {
    %c0_i32 = arith.constant 0 : i32
    %c0_i32_0 = arith.constant 0 : i32
    %c0_i32_1 = arith.constant 0 : i32
    return %c0_i32, %c0_i32_0 : i32, i32
  }
  func.func @transform_10(%arg0: i32) -> (i32, i32, i32) {
    %c0_i32 = arith.constant 0 : i32
    %c0_i32_0 = arith.constant 0 : i32
    %c0_i32_1 = arith.constant 0 : i32
    return %arg0, %c0_i32, %c0_i32_0 : i32, i32, i32
  }
}

module attributes {stable_mosaic.version = 11 : i64} {
  func.func @kernel(%arg0: i32, %arg1: memref<1x16x4xf32, #tpu.memory_space<vmem>>, %arg2: memref<1x4xf32, #tpu.memory_space<vmem>>, %arg3: memref<1x4xf32, #tpu.memory_space<vmem>>, %arg4: memref<4x4xbf16, #tpu.memory_space<vmem>>, %arg5: memref<1x4xf32, #tpu.memory_space<vmem>>, %arg6: memref<3x4x32xbf16, #tpu.memory_space<vmem>>, %arg7: memref<1x32xf32, #tpu.memory_space<vmem>>, %arg8: memref<3x32x32xbf16, #tpu.memory_space<vmem>>, %arg9: memref<1x32xf32, #tpu.memory_space<vmem>>, %arg10: memref<16x32xf32, #tpu.memory_space<vmem>>, %arg11: memref<1x16x32xf32, #tpu.memory_space<vmem>>) attributes {dimension_semantics = [#tpu.dimension_semantics<parallel>], iteration_bounds = array<i64: 2>, scalar_prefetch = 0 : i64, scratch_operands = 0 : i64, tpu.core_type = #tpu.core_type<tc>, window_params = [{transform_indices = @transform_0, window_bounds = array<i64: 1, 16, 4>}, {pipeline_mode = #tpu.pipeline_mode<synchronous>, transform_indices = @transform_1, window_bounds = array<i64: 1, 4>}, {pipeline_mode = #tpu.pipeline_mode<synchronous>, transform_indices = @transform_2, window_bounds = array<i64: 1, 4>}, {pipeline_mode = #tpu.pipeline_mode<synchronous>, transform_indices = @transform_3, window_bounds = array<i64: 4, 4>}, {pipeline_mode = #tpu.pipeline_mode<synchronous>, transform_indices = @transform_4, window_bounds = array<i64: 1, 4>}, {pipeline_mode = #tpu.pipeline_mode<synchronous>, transform_indices = @transform_5, window_bounds = array<i64: 3, 4, 32>}, {pipeline_mode = #tpu.pipeline_mode<synchronous>, transform_indices = @transform_6, window_bounds = array<i64: 1, 32>}, {pipeline_mode = #tpu.pipeline_mode<synchronous>, transform_indices = @transform_7, window_bounds = array<i64: 3, 32, 32>}, {pipeline_mode = #tpu.pipeline_mode<synchronous>, transform_indices = @transform_8, window_bounds = array<i64: 1, 32>}, {pipeline_mode = #tpu.pipeline_mode<synchronous>, transform_indices = @transform_9, window_bounds = array<i64: 16, 32>}, {transform_indices = @transform_10, window_bounds = array<i64: 1, 16, 32>}]} {
    %c0 = arith.constant 0 : index
    %c0_0 = arith.constant 0 : index
    %c0_1 = arith.constant 0 : index
    %0 = vector.load %arg1[%c0, %c0_0, %c0_1] : memref<1x16x4xf32, #tpu.memory_space<vmem>>, vector<1x16x4xf32>
    %1 = vector.shape_cast %0 : vector<1x16x4xf32> to vector<16x4xf32>
    %c0_2 = arith.constant 0 : index
    %c0_3 = arith.constant 0 : index
    %2 = vector.load %arg2[%c0_2, %c0_3] : memref<1x4xf32, #tpu.memory_space<vmem>>, vector<1x4xf32>
    %3 = vector.shape_cast %2 : vector<1x4xf32> to vector<4xf32>
    %c0_4 = arith.constant 0 : index
    %c0_5 = arith.constant 0 : index
    %4 = vector.load %arg3[%c0_4, %c0_5] : memref<1x4xf32, #tpu.memory_space<vmem>>, vector<1x4xf32>
    %5 = vector.shape_cast %4 : vector<1x4xf32> to vector<4xf32>
    %cst = arith.constant dense<0.000000e+00> : vector<16xf32>
    %6 = vector.multi_reduction <add>, %1, %cst [1] : vector<16x4xf32> to vector<16xf32>
    %7 = vector.shape_cast %6 : vector<16xf32> to vector<16x1xf32>
    %cst_6 = arith.constant 4.000000e+00 : f32
    %8 = vector.broadcast %cst_6 : f32 to vector<16x1xf32>
    %9 = arith.divf %7, %8 : vector<16x1xf32>
    %10 = vector.broadcast %9 : vector<16x1xf32> to vector<16x4xf32>
    %11 = arith.subf %1, %10 : vector<16x4xf32>
    %12 = arith.mulf %11, %11 : vector<16x4xf32>
    %cst_7 = arith.constant dense<0.000000e+00> : vector<16xf32>
    %13 = vector.multi_reduction <add>, %12, %cst_7 [1] : vector<16x4xf32> to vector<16xf32>
    %14 = vector.shape_cast %13 : vector<16xf32> to vector<16x1xf32>
    %cst_8 = arith.constant 4.000000e+00 : f32
    %15 = vector.broadcast %cst_8 : f32 to vector<16x1xf32>
    %16 = arith.divf %14, %15 : vector<16x1xf32>
    %17 = vector.broadcast %9 : vector<16x1xf32> to vector<16x4xf32>
    %18 = arith.subf %1, %17 : vector<16x4xf32>
    %cst_9 = arith.constant 9.99999974E-6 : f32
    %19 = vector.broadcast %cst_9 : f32 to vector<16x1xf32>
    %20 = arith.addf %16, %19 : vector<16x1xf32>
    %21 = math.rsqrt %20 : vector<16x1xf32>
    %22 = vector.broadcast %21 : vector<16x1xf32> to vector<16x4xf32>
    %23 = arith.mulf %18, %22 : vector<16x4xf32>
    %24 = vector.shape_cast %3 : vector<4xf32> to vector<1x4xf32>
    %25 = vector.broadcast %24 : vector<1x4xf32> to vector<16x4xf32>
    %26 = arith.mulf %23, %25 : vector<16x4xf32>
    %27 = vector.shape_cast %5 : vector<4xf32> to vector<1x4xf32>
    %28 = vector.broadcast %27 : vector<1x4xf32> to vector<16x4xf32>
    %29 = arith.addf %26, %28 : vector<16x4xf32>
    %30 = arith.truncf %29 : vector<16x4xf32> to vector<16x4xbf16>
    %c0_10 = arith.constant 0 : index
    %c0_11 = arith.constant 0 : index
    %31 = vector.load %arg4[%c0_10, %c0_11] : memref<4x4xbf16, #tpu.memory_space<vmem>>, vector<4x4xbf16>
    %cst_12 = arith.constant dense<0.000000e+00> : vector<16x4xf32>
    %32 = tpu.matmul %30, %31, %cst_12 {dimension_numbers = #tpu.dot_dimension_numbers<[1], [0], [0], [1], [0, 0, 1, 1], [], []>} : vector<16x4xbf16>, vector<4x4xbf16>, vector<16x4xf32> -> vector<16x4xf32>
    %c0_13 = arith.constant 0 : index
    %c0_14 = arith.constant 0 : index
    %33 = vector.load %arg5[%c0_13, %c0_14] : memref<1x4xf32, #tpu.memory_space<vmem>>, vector<1x4xf32>
    %34 = vector.shape_cast %33 : vector<1x4xf32> to vector<4xf32>
    %35 = vector.shape_cast %34 : vector<4xf32> to vector<1x4xf32>
    %36 = vector.broadcast %35 : vector<1x4xf32> to vector<16x4xf32>
    %37 = arith.addf %32, %36 : vector<16x4xf32>
    %c0_15 = arith.constant 0 : index
    %c0_16 = arith.constant 0 : index
    %38 = vector.load %arg7[%c0_15, %c0_16] : memref<1x32xf32, #tpu.memory_space<vmem>>, vector<1x32xf32>
    %39 = vector.shape_cast %38 : vector<1x32xf32> to vector<32xf32>
    %cst_17 = arith.constant 0.000000e+00 : f32
    %40 = vector.broadcast %cst_17 : f32 to vector<16x32xf32>
    %c1_i32 = arith.constant 1 : i32
    %41 = tpu.dynamic_rotate %37 by %c1_i32 dim 0 : vector<16x4xf32>, i32 -> vector<16x4xf32>
    %42 = tpu.iota {dimensions = array<i32: 0>} : vector<16x4xi32>
    %c1_i32_18 = arith.constant 1 : i32
    %43 = vector.broadcast %c1_i32_18 : i32 to vector<16x4xi32>
    %44 = arith.cmpi sge, %42, %43 : vector<16x4xi32>
    %cst_19 = arith.constant 0.000000e+00 : f32
    %45 = vector.broadcast %cst_19 : f32 to vector<16x4xf32>
    %46 = arith.select %44, %41, %45 : vector<16x4xi1>, vector<16x4xf32>
    %47 = arith.truncf %46 : vector<16x4xf32> to vector<16x4xbf16>
    %c0_20 = arith.constant 0 : index
    %c0_21 = arith.constant 0 : index
    %c0_22 = arith.constant 0 : index
    %48 = vector.load %arg6[%c0_20, %c0_21, %c0_22] : memref<3x4x32xbf16, #tpu.memory_space<vmem>>, vector<1x4x32xbf16>
    %49 = vector.shape_cast %48 : vector<1x4x32xbf16> to vector<4x32xbf16>
    %cst_23 = arith.constant dense<0.000000e+00> : vector<16x32xf32>
    %50 = tpu.matmul %47, %49, %cst_23 {dimension_numbers = #tpu.dot_dimension_numbers<[1], [0], [0], [1], [0, 0, 1, 1], [], []>} : vector<16x4xbf16>, vector<4x32xbf16>, vector<16x32xf32> -> vector<16x32xf32>
    %51 = arith.addf %40, %50 : vector<16x32xf32>
    %52 = arith.truncf %37 : vector<16x4xf32> to vector<16x4xbf16>
    %c1 = arith.constant 1 : index
    %c0_24 = arith.constant 0 : index
    %c0_25 = arith.constant 0 : index
    %53 = vector.load %arg6[%c1, %c0_24, %c0_25] : memref<3x4x32xbf16, #tpu.memory_space<vmem>>, vector<1x4x32xbf16>
    %54 = vector.shape_cast %53 : vector<1x4x32xbf16> to vector<4x32xbf16>
    %cst_26 = arith.constant dense<0.000000e+00> : vector<16x32xf32>
    %55 = tpu.matmul %52, %54, %cst_26 {dimension_numbers = #tpu.dot_dimension_numbers<[1], [0], [0], [1], [0, 0, 1, 1], [], []>} : vector<16x4xbf16>, vector<4x32xbf16>, vector<16x32xf32> -> vector<16x32xf32>
    %56 = arith.addf %51, %55 : vector<16x32xf32>
    %c15_i32 = arith.constant 15 : i32
    %57 = tpu.dynamic_rotate %37 by %c15_i32 dim 0 : vector<16x4xf32>, i32 -> vector<16x4xf32>
    %58 = tpu.iota {dimensions = array<i32: 0>} : vector<16x4xi32>
    %c15_i32_27 = arith.constant 15 : i32
    %59 = vector.broadcast %c15_i32_27 : i32 to vector<16x4xi32>
    %60 = arith.cmpi slt, %58, %59 : vector<16x4xi32>
    %cst_28 = arith.constant 0.000000e+00 : f32
    %61 = vector.broadcast %cst_28 : f32 to vector<16x4xf32>
    %62 = arith.select %60, %57, %61 : vector<16x4xi1>, vector<16x4xf32>
    %63 = arith.truncf %62 : vector<16x4xf32> to vector<16x4xbf16>
    %c2 = arith.constant 2 : index
    %c0_29 = arith.constant 0 : index
    %c0_30 = arith.constant 0 : index
    %64 = vector.load %arg6[%c2, %c0_29, %c0_30] : memref<3x4x32xbf16, #tpu.memory_space<vmem>>, vector<1x4x32xbf16>
    %65 = vector.shape_cast %64 : vector<1x4x32xbf16> to vector<4x32xbf16>
    %cst_31 = arith.constant dense<0.000000e+00> : vector<16x32xf32>
    %66 = tpu.matmul %63, %65, %cst_31 {dimension_numbers = #tpu.dot_dimension_numbers<[1], [0], [0], [1], [0, 0, 1, 1], [], []>} : vector<16x4xbf16>, vector<4x32xbf16>, vector<16x32xf32> -> vector<16x32xf32>
    %67 = arith.addf %56, %66 : vector<16x32xf32>
    %68 = vector.shape_cast %39 : vector<32xf32> to vector<1x32xf32>
    %69 = vector.broadcast %68 : vector<1x32xf32> to vector<16x32xf32>
    %70 = arith.addf %67, %69 : vector<16x32xf32>
    %cst_32 = arith.constant 5.000000e-01 : f32
    %71 = vector.broadcast %cst_32 : f32 to vector<16x32xf32>
    %72 = arith.mulf %71, %70 : vector<16x32xf32>
    %cst_33 = arith.constant 4.471500e-02 : f32
    %73 = vector.broadcast %cst_33 : f32 to vector<16x32xf32>
    %74 = arith.mulf %73, %70 : vector<16x32xf32>
    %75 = arith.mulf %74, %70 : vector<16x32xf32>
    %76 = arith.mulf %75, %70 : vector<16x32xf32>
    %77 = arith.addf %70, %76 : vector<16x32xf32>
    %cst_34 = arith.constant 0.797884583 : f32
    %78 = vector.broadcast %cst_34 : f32 to vector<16x32xf32>
    %79 = arith.mulf %78, %77 : vector<16x32xf32>
    %80 = math.tanh %79 : vector<16x32xf32>
    %cst_35 = arith.constant 1.000000e+00 : f32
    %81 = vector.broadcast %cst_35 : f32 to vector<16x32xf32>
    %82 = arith.addf %81, %80 : vector<16x32xf32>
    %83 = arith.mulf %72, %82 : vector<16x32xf32>
    %c0_36 = arith.constant 0 : index
    %c0_37 = arith.constant 0 : index
    %84 = vector.load %arg9[%c0_36, %c0_37] : memref<1x32xf32, #tpu.memory_space<vmem>>, vector<1x32xf32>
    %85 = vector.shape_cast %84 : vector<1x32xf32> to vector<32xf32>
    %cst_38 = arith.constant 0.000000e+00 : f32
    %86 = vector.broadcast %cst_38 : f32 to vector<16x32xf32>
    %c2_i32 = arith.constant 2 : i32
    %87 = tpu.dynamic_rotate %83 by %c2_i32 dim 0 : vector<16x32xf32>, i32 -> vector<16x32xf32>
    %88 = tpu.iota {dimensions = array<i32: 0>} : vector<16x32xi32>
    %c2_i32_39 = arith.constant 2 : i32
    %89 = vector.broadcast %c2_i32_39 : i32 to vector<16x32xi32>
    %90 = arith.cmpi sge, %88, %89 : vector<16x32xi32>
    %cst_40 = arith.constant 0.000000e+00 : f32
    %91 = vector.broadcast %cst_40 : f32 to vector<16x32xf32>
    %92 = arith.select %90, %87, %91 : vector<16x32xi1>, vector<16x32xf32>
    %93 = arith.truncf %92 : vector<16x32xf32> to vector<16x32xbf16>
    %c0_41 = arith.constant 0 : index
    %c0_42 = arith.constant 0 : index
    %c0_43 = arith.constant 0 : index
    %94 = vector.load %arg8[%c0_41, %c0_42, %c0_43] : memref<3x32x32xbf16, #tpu.memory_space<vmem>>, vector<1x32x32xbf16>
    %95 = vector.shape_cast %94 : vector<1x32x32xbf16> to vector<32x32xbf16>
    %cst_44 = arith.constant dense<0.000000e+00> : vector<16x32xf32>
    %96 = tpu.matmul %93, %95, %cst_44 {dimension_numbers = #tpu.dot_dimension_numbers<[1], [0], [0], [1], [0, 0, 1, 1], [], []>} : vector<16x32xbf16>, vector<32x32xbf16>, vector<16x32xf32> -> vector<16x32xf32>
    %97 = arith.addf %86, %96 : vector<16x32xf32>
    %98 = arith.truncf %83 : vector<16x32xf32> to vector<16x32xbf16>
    %c1_45 = arith.constant 1 : index
    %c0_46 = arith.constant 0 : index
    %c0_47 = arith.constant 0 : index
    %99 = vector.load %arg8[%c1_45, %c0_46, %c0_47] : memref<3x32x32xbf16, #tpu.memory_space<vmem>>, vector<1x32x32xbf16>
    %100 = vector.shape_cast %99 : vector<1x32x32xbf16> to vector<32x32xbf16>
    %cst_48 = arith.constant dense<0.000000e+00> : vector<16x32xf32>
    %101 = tpu.matmul %98, %100, %cst_48 {dimension_numbers = #tpu.dot_dimension_numbers<[1], [0], [0], [1], [0, 0, 1, 1], [], []>} : vector<16x32xbf16>, vector<32x32xbf16>, vector<16x32xf32> -> vector<16x32xf32>
    %102 = arith.addf %97, %101 : vector<16x32xf32>
    %c14_i32 = arith.constant 14 : i32
    %103 = tpu.dynamic_rotate %83 by %c14_i32 dim 0 : vector<16x32xf32>, i32 -> vector<16x32xf32>
    %104 = tpu.iota {dimensions = array<i32: 0>} : vector<16x32xi32>
    %c14_i32_49 = arith.constant 14 : i32
    %105 = vector.broadcast %c14_i32_49 : i32 to vector<16x32xi32>
    %106 = arith.cmpi slt, %104, %105 : vector<16x32xi32>
    %cst_50 = arith.constant 0.000000e+00 : f32
    %107 = vector.broadcast %cst_50 : f32 to vector<16x32xf32>
    %108 = arith.select %106, %103, %107 : vector<16x32xi1>, vector<16x32xf32>
    %109 = arith.truncf %108 : vector<16x32xf32> to vector<16x32xbf16>
    %c2_51 = arith.constant 2 : index
    %c0_52 = arith.constant 0 : index
    %c0_53 = arith.constant 0 : index
    %110 = vector.load %arg8[%c2_51, %c0_52, %c0_53] : memref<3x32x32xbf16, #tpu.memory_space<vmem>>, vector<1x32x32xbf16>
    %111 = vector.shape_cast %110 : vector<1x32x32xbf16> to vector<32x32xbf16>
    %cst_54 = arith.constant dense<0.000000e+00> : vector<16x32xf32>
    %112 = tpu.matmul %109, %111, %cst_54 {dimension_numbers = #tpu.dot_dimension_numbers<[1], [0], [0], [1], [0, 0, 1, 1], [], []>} : vector<16x32xbf16>, vector<32x32xbf16>, vector<16x32xf32> -> vector<16x32xf32>
    %113 = arith.addf %102, %112 : vector<16x32xf32>
    %114 = vector.shape_cast %85 : vector<32xf32> to vector<1x32xf32>
    %115 = vector.broadcast %114 : vector<1x32xf32> to vector<16x32xf32>
    %116 = arith.addf %113, %115 : vector<16x32xf32>
    %cst_55 = arith.constant 5.000000e-01 : f32
    %117 = vector.broadcast %cst_55 : f32 to vector<16x32xf32>
    %118 = arith.mulf %117, %116 : vector<16x32xf32>
    %cst_56 = arith.constant 4.471500e-02 : f32
    %119 = vector.broadcast %cst_56 : f32 to vector<16x32xf32>
    %120 = arith.mulf %119, %116 : vector<16x32xf32>
    %121 = arith.mulf %120, %116 : vector<16x32xf32>
    %122 = arith.mulf %121, %116 : vector<16x32xf32>
    %123 = arith.addf %116, %122 : vector<16x32xf32>
    %cst_57 = arith.constant 0.797884583 : f32
    %124 = vector.broadcast %cst_57 : f32 to vector<16x32xf32>
    %125 = arith.mulf %124, %123 : vector<16x32xf32>
    %126 = math.tanh %125 : vector<16x32xf32>
    %cst_58 = arith.constant 1.000000e+00 : f32
    %127 = vector.broadcast %cst_58 : f32 to vector<16x32xf32>
    %128 = arith.addf %127, %126 : vector<16x32xf32>
    %129 = arith.mulf %118, %128 : vector<16x32xf32>
    %c0_59 = arith.constant 0 : index
    %c0_60 = arith.constant 0 : index
    %130 = vector.load %arg10[%c0_59, %c0_60] : memref<16x32xf32, #tpu.memory_space<vmem>>, vector<16x32xf32>
    %131 = arith.addf %129, %130 : vector<16x32xf32>
    %c0_61 = arith.constant 0 : index
    %c0_62 = arith.constant 0 : index
    %c0_63 = arith.constant 0 : index
    %132 = vector.load %arg11[%c0_61, %c0_62, %c0_63] : memref<1x16x32xf32, #tpu.memory_space<vmem>>, vector<1x16x32xf32>
    %133 = vector.shape_cast %132 : vector<1x16x32xf32> to vector<16x32xf32>
    %134 = vector.shape_cast %131 : vector<16x32xf32> to vector<1x16x32xf32>
    tpu.vector_store %arg11[%c0_61, %c0_62, %c0_63], %134 {strides = array<i32>} : memref<1x16x32xf32, #tpu.memory_space<vmem>>, vector<1x16x32xf32>,
    return
  }
  func.func @transform_0(%arg0: i32) -> (i32, i32, i32) {
    %c0_i32 = arith.constant 0 : i32
    %c0_i32_0 = arith.constant 0 : i32
    %c0_i32_1 = arith.constant 0 : i32
    return %arg0, %c0_i32, %c0_i32_0 : i32, i32, i32
  }
  func.func @transform_1(%arg0: i32) -> (i32, i32) {
    %c0_i32 = arith.constant 0 : i32
    %c0_i32_0 = arith.constant 0 : i32
    %c0_i32_1 = arith.constant 0 : i32
    return %c0_i32, %c0_i32_0 : i32, i32
  }
  func.func @transform_2(%arg0: i32) -> (i32, i32) {
    %c0_i32 = arith.constant 0 : i32
    %c0_i32_0 = arith.constant 0 : i32
    %c0_i32_1 = arith.constant 0 : i32
    return %c0_i32, %c0_i32_0 : i32, i32
  }
  func.func @transform_3(%arg0: i32) -> (i32, i32) {
    %c0_i32 = arith.constant 0 : i32
    %c0_i32_0 = arith.constant 0 : i32
    %c0_i32_1 = arith.constant 0 : i32
    return %c0_i32, %c0_i32_0 : i32, i32
  }
  func.func @transform_4(%arg0: i32) -> (i32, i32) {
    %c0_i32 = arith.constant 0 : i32
    %c0_i32_0 = arith.constant 0 : i32
    %c0_i32_1 = arith.constant 0 : i32
    return %c0_i32, %c0_i32_0 : i32, i32
  }
  func.func @transform_5(%arg0: i32) -> (i32, i32, i32) {
    %c0_i32 = arith.constant 0 : i32
    %c0_i32_0 = arith.constant 0 : i32
    %c0_i32_1 = arith.constant 0 : i32
    %c0_i32_2 = arith.constant 0 : i32
    return %c0_i32, %c0_i32_0, %c0_i32_1 : i32, i32, i32
  }
  func.func @transform_6(%arg0: i32) -> (i32, i32) {
    %c0_i32 = arith.constant 0 : i32
    %c0_i32_0 = arith.constant 0 : i32
    %c0_i32_1 = arith.constant 0 : i32
    return %c0_i32, %c0_i32_0 : i32, i32
  }
  func.func @transform_7(%arg0: i32) -> (i32, i32, i32) {
    %c0_i32 = arith.constant 0 : i32
    %c0_i32_0 = arith.constant 0 : i32
    %c0_i32_1 = arith.constant 0 : i32
    %c0_i32_2 = arith.constant 0 : i32
    return %c0_i32, %c0_i32_0, %c0_i32_1 : i32, i32, i32
  }
  func.func @transform_8(%arg0: i32) -> (i32, i32) {
    %c0_i32 = arith.constant 0 : i32
    %c0_i32_0 = arith.constant 0 : i32
    %c0_i32_1 = arith.constant 0 : i32
    return %c0_i32, %c0_i32_0 : i32, i32
  }
  func.func @transform_9(%arg0: i32) -> (i32, i32) {
    %c0_i32 = arith.constant 0 : i32
    %c0_i32_0 = arith.constant 0 : i32
    %c0_i32_1 = arith.constant 0 : i32
    return %c0_i32, %c0_i32_0 : i32, i32
  }
  func.func @transform_10(%arg0: i32) -> (i32, i32, i32) {
    %c0_i32 = arith.constant 0 : i32
    %c0_i32_0 = arith.constant 0 : i32
    %c0_i32_1 = arith.constant 0 : i32
    return %arg0, %c0_i32, %c0_i32_0 : i32, i32, i32
  }
}

</mosaic_0001>

<bundles_post_ra>
// kernel: tpu_custom_call.1
= control target key start
LH: loop header
LB: loop body
LE: loop exit
PB: predicated region body
PF: predicated region fallthrough
CT: control target
= control target key end

     0   :  { %15 = vsyncpa [#allocation3], 0  ;;  %s1794_s0 = inlined_call_operand.vmem [shape: f32[2,16,4], index: 0, kind: input, shape index: {}]   ;;  %s1795_s1 = inlined_call_operand.vmem [shape: f32[1,4], index: 1, kind: input, shape index: {}]   ;;  %s1796_s2 = inlined_call_operand.vmem [shape: f32[1,4], index: 2, kind: input, shape index: {}]   ;;  %s1797_s3 = inlined_call_operand.vmem [shape: bf16[4,4], index: 3, kind: input, shape index: {}]   ;;  %s1798_s4 = inlined_call_operand.hbm [shape: f32[1,4], index: 4, kind: input, shape index: {}]   ;;  %s1799_s5 = inlined_call_operand.hbm [shape: bf16[3,4,32], index: 5, kind: input, shape index: {}]   ;;  %s1800_s6 = inlined_call_operand.hbm [shape: f32[1,32], index: 6, kind: input, shape index: {}]   ;;  %s1801_s7 = inlined_call_operand.vmem [shape: bf16[3,32,32], index: 7, kind: input, shape index: {}]   ;;  %s1802_s8 = inlined_call_operand.vmem [shape: f32[1,32], index: 8, kind: input, shape index: {}]   ;;  %s1803_s9 = inlined_call_operand.hbm [shape: f32[16,32], index: 9, kind: input, shape index: {}]   ;;  %s1804_s10 = inlined_call_operand.hbm [shape: f32[2,16,32], index: 10, kind: output, shape index: {}]  }
   0x1   :  { %16 = vsyncpa [#allocation6], 0 }
   0x2   :  { %17 = vsyncpa [#allocation9], 0 }
   0x3   :  { %18 = vsyncpa [#allocation4], 0 }
   0x4   :  { %20 = vsyncpa [#allocation4 + $0x1], 0  ;;  %s1539_s13 = smov 0   ;;  %s1541_s14 = smov 0  }
   0x5   :  { %s1543_s15 = smov 0   ;;  %s1545_s16 = smov 0  }
   0x6 LB: > { %1807 = sst [smem:[#allocation15_spill]] %s1465_s15  ;;  %s1560_s17 = sadd.s32 4294967295, %s1469_s16   ;;  %s1469_s16 = sphi %s1545_s16, %s1824_s16   ;;  %s1465_s15 = sphi %s1543_s15, %s1821_s15   ;;  %s1461_s14 = sphi %s1541_s14, %s1823_s14   ;;  %s1457_s13 = sphi %s1539_s13, %s1822_s13  }
   0x7   : > { %s1074_s18 = sadd.s32 4294967294, %s1469_s16   ;;  %s1564_s19 = sadd.s32 1, %s1469_s16  }
   0x8   : > { %s248_s20 = sadd.s32 1, %s1465_s15  ;;  %s245_s21 = ssub.s32 %s1469_s16, %s1564_s19 }
   0x9   : > { %p258_p0 = scmp.ne.s32.totalorder %s1465_s15, %s1461_s14  ;;  %p246_p1 = scmp.eq.s32.totalorder %s245_s21, 0 }
   0xa   : > { %p259_p2 = scmp.eq.s32.totalorder %s1560_s17, 1  ;;  %p264_p3 = scmp.ne.s32.totalorder %s1461_s14, %s1457_s13 }
   0xb   : > { %p265_p4 = scmp.eq.s32.totalorder %s1074_s18, 1  ;;  %p1075_p7 = scmp.ge.s32.totalorder %s1469_s16, 1 }
   0xc   : > { %s1575_s22 = scalar_select %p246_p1, %s1465_s15, %s248_s20  }
   0xd   : > { %p1577_p5 = por %p259_p2, %p258_p0  ;;  %p1581_p6 = por %p265_p4, %p264_p3 }
   0xe   : > { %1808 = sst [smem:[#allocation16_spill]] %s1575_s22  ;;  %p272_p8 = scmp.lt.s32.totalorder %s1469_s16, 3 }
   0xf   : > { %s1810_s24 = scalar_select %p1581_p6, 1, 0 }
  0x10   : > { %p1805_p9 = scmp.eq.s32.totalorder %s1560_s17, 0  ;;  %p1588_p10 = pnand %p1075_p7, %p272_p8 }
  0x11   : > { %s1471_s26 = smov [#allocation5]   ;;  %s1472_s29 = smov [#allocation2]  }
  0x12   : > { %s304_s27 = sshll.u32 %s1471_s26, 4  ;;  %p1205_p11 = pneg %p1588_p10  ;;  %s305_s27 = int_to_ptr.vmem [resolvable:$true] %s304_s27 }
  0x13   : > { %s294_s30 = sshll.u32 %s1472_s29, 4  ;;  %s1473_s11 = smov [#allocation7]   ;;  %s295_s30 = int_to_ptr.vmem [resolvable:$true] %s294_s30 }
  0x14   : > { %p1596_p12 = pnand %p1805_p9, %p1205_p11  ;;  %s318_s12 = sshll.u32 %s1473_s11, 4  ;;  %s319_s12 = int_to_ptr.vmem [resolvable:$true] %s318_s12 }
  0x15   : > { %s1304_s18 = scalar_lea.vmem %s305_s27, 96  ;;  %p1312_p3 = scmp.lt.s32.totalorder %s305_s27, %s305_s27 }
  0x16   : > { %p1295_p13 = pneg %p1596_p12  ;;  %p1305_p0 = scmp.ne.s32.totalorder %s305_s27, %s1304_s18 }
  0x17   : > { %p1313_p4 = scmp.lt.s32.totalorder %s1304_s18, %s1304_s18 }
  0x18   : > { %p1307_p1 = pnand %p1305_p0, %p1295_p13 }
  0x19   : > { %p1314_p7 = por %p1313_p4, %p1312_p3 }
  0x1a   : > { %p1308_p2 = pneg %p1307_p1 }
  0x1c   : > { %p1315_p8 = pnand %p1314_p7, %p1308_p2 }
  0x1e   : > { %1318 = shalt.err (!%p1315_p8)
}
  0x1f   : > { %s1474_s20 = smov 32   ;;  %s1475_s21 = smov 2  }
  0x20   : > { %1211 = dma.hbm_to_vmem [thread:$0]  (!%p1596_p12), %s1799_s5, 96, %s305_s27, [#allocation6], %s1474_s20, %s1474_s20, %s1475_s21  }
  0x21   : > { %s1330_s11 = scalar_lea.vmem %s295_s30, 16  ;;  %s1337_s22 = scalar_lea.vmem %s295_s30, 32 }
  0x22   : > { %p1331_p11 = scmp.ne.s32.totalorder %s295_s30, %s1330_s11  ;;  %p1338_p9 = scmp.lt.s32.totalorder %s295_s30, %s295_s30 }
  0x23   : > { %p1339_p3 = scmp.lt.s32.totalorder %s1337_s22, %s1330_s11 }
  0x24   : > { %p1333_p0 = pnand %p1331_p11, %p1295_p13 }
  0x25   : > { %p1340_p2 = por %p1339_p3, %p1338_p9 }
  0x26   : > { %p1334_p1 = pneg %p1333_p0 }
  0x28   : > { %p1341_p4 = pnand %p1340_p2, %p1334_p1 }
  0x2a   : > { %1344 = shalt.err (!%p1341_p4)
}
  0x2b   : > { %1208 = dma.hbm_to_vmem [thread:$0]  (!%p1596_p12), %s1798_s4, 16, %s295_s30, [#allocation3]  }
  0x2c   : > { %s1356_s27 = scalar_lea.vmem %s319_s12, 16  ;;  %s1363_s20 = scalar_lea.vmem %s319_s12, 32 }
  0x2d   : > { %p1357_p7 = scmp.ne.s32.totalorder %s319_s12, %s1356_s27  ;;  %p1364_p0 = scmp.lt.s32.totalorder %s319_s12, %s319_s12 }
  0x2e   : > { %p1365_p6 = scmp.lt.s32.totalorder %s1363_s20, %s1356_s27 }
  0x2f   : > { %p1359_p8 = pnand %p1357_p7, %p1295_p13 }
  0x30   : > { %p1366_p9 = por %p1365_p6, %p1364_p0 }
  0x31   : > { %p1360_p11 = pneg %p1359_p8 }
  0x33   : > { %p1367_p1 = pnand %p1366_p9, %p1360_p11 }
  0x35   : > { %1370 = shalt.err (!%p1367_p1)
}
  0x36   : > { %1214 = dma.hbm_to_vmem [thread:$0]  (!%p1596_p12), %s1800_s6, 16, %s319_s12, [#allocation6]  }
  0x37   : > { %s1476_s15 = smov [#allocation8]  }
  0x38   : > { %s334_s30 = sshll.u32 %s1476_s15, 4  ;;  %s335_s30 = int_to_ptr.vmem [resolvable:$true] %s334_s30 }
  0x39   : > { %s1382_s26 = scalar_lea.vmem %s335_s30, 256  ;;  %p1390_p7 = scmp.lt.s32.totalorder %s335_s30, %s335_s30 }
  0x3a   : > { %p1383_p3 = scmp.ne.s32.totalorder %s335_s30, %s1382_s26  ;;  %p1391_p6 = scmp.lt.s32.totalorder %s1382_s26, %s1382_s26 }
  0x3c   : > { %p1385_p2 = pnand %p1383_p3, %p1295_p13  ;;  %p1392_p8 = por %p1391_p6, %p1390_p7 }
  0x3e   : > { %p1386_p4 = pneg %p1385_p2 }
  0x40   : > { %p1393_p11 = pnand %p1392_p8, %p1386_p4 }
  0x42   : > { %1396 = shalt.err (!%p1393_p11)
}
  0x43   : > { %s1477_s29 = smov 128   ;;  %s1478_s11 = smov 8  }
  0x44   : > { %1217 = dma.hbm_to_vmem [thread:$0]  (!%p1596_p12), %s1803_s9, 256, %s335_s30, [#allocation9], %s1477_s29, %s1477_s29, %s1478_s11  }
  0x45   : > { %358 = sbr.rel (%p1588_p10) target bundleno = 1095 (0x447), region = 60  ;;  %p1813_p0 = scmp.eq.s32.totalorder (!%p1588_p10), %s1560_s17, 0 }
  0x4a   : > { %1440 = dma.done.wait (%p1813_p0), [#allocation3], 16   ;;  %p1814_p13 = pmov %p1813_p0 }
  0x4b   : > { %p1815_p9 = pmov %p1813_p0 }
  0x4c   : > { %1442 = vsyncadd (%p1814_p13), [#allocation3], 4294967280 }
  0x4d   : > { %1444 = dma.done.wait (%p1815_p9), [#allocation6], 112   ;;  %p1816_p1 = pmov %p1813_p0 }
  0x4e   : > { %p1817_p3 = pmov %p1813_p0 }
  0x4f   : > { %1446 = vsyncadd (%p1816_p1), [#allocation6], 4294967184 }
  0x50   : > { %1448 = dma.done.wait (%p1817_p3), [#allocation9], 256   ;;  %p1818_p12 = pmov %p1813_p0 }
  0x51   : > { %p408_p10 = scmp.lt.s32.totalorder %s1560_s17, 1  ;;  %vm418_vm0 = vcmask 31744   ;;  %v463_v14 = vld [vmem:[%s1797_s3] sm:$0x3]  ;;  %vm474_vm1 = vcmask 1041408   ;;  %v1479_v15 = vmov 0.0   ;;  %v522_v38 = vlaneseq }
  0x52   : > { %1450 = vsyncadd (%p1818_p12), [#allocation9], 4294967040  ;;  %1139 = vmatprep.subr.bf16.mxu0 %v1479_v15  ;;  %v476_v16 = vsel %vm474_vm1, %v463_v14, 0  ;;  %vm1480_vm2 = vmmov 0   ;;  %1145 = vmatprep.subr.bf16.mxu1 %v1479_v15  ;;  %v1089_v25 = vld [vmem:[%s1795_s1] ss:$0 sm:$0xff] }
  0x53   : > { %s409_s25 = scalar_select %p408_p10, %s1560_s17, 1  ;;  %1141 = vmatprep.mubr.msk.bf16.mxu0 %vm1480_vm2, %v1479_v15  ;;  %1140 = vmatpush3.bf16.msra.mxu0 %v476_v16  ;;  %v1090_v29 = vld [vmem:[%s1796_s2] ss:$0 sm:$0xff]  ;;  %v536_v34 = vld [vmem:[#allocation5 + $0x2] sm:$0x3]  ;;  %v1681_v41 = vshrl.u32 %v522_v38, 7 }
  0x54   : > { %1151 = vmatprep.subr.bf16.mxu0 %v1479_v15  ;;  %1147 = vmatprep.mubr.msk.bf16.mxu1 %vm1480_vm2, %v1479_v15  ;;  %v541_v35 = vsel %vm474_vm1, %v536_v34, 0  ;;  %v533_v36 = vld [vmem:[#allocation5] sm:$0x3]  ;;  %v1091_v39 = vld [vmem:[#allocation2] ss:$0 sm:$0xff]  ;;  %v1275_v63 = vld [vmem:[%s1801_s7 + $0x18] sm:$0xff]  }
  0x55   : > { %s1120_s28 = sshll.u32 %s409_s25, 4  ;;  %1146 = vmatpush3.bf16.msra.mxu1 %v541_v35  ;;  %v588_v37 = vsel %vm474_vm1, %v533_v36, 0  ;;  %v642_v44 = vld [vmem:[#allocation5 + $0x4] sm:$0x3]  ;;  %vm524_vm3 = vcmp.lt.s32.totalorder %v1681_v41, 1  ;;  %v1685_v47 = vadd.s32 8, %v1681_v41 }
  0x56   : > { %s412_s22 = scalar_lea.vmem %s1794_s0, %s1120_s28  ;;  %1157 = vmatprep.subr.bf16.mxu1 %v1479_v15  ;;  %vm528_vm4 = vcmp.ge.s32.totalorder %v1681_v41, 1  ;;  %vm633_vm5 = vcmp.lt.s32.totalorder %v1681_v41, 7  ;;  %v647_v50 = vsel %vm474_vm1, %v642_v44, 0  ;;  %vm751_vm7 = vcmask 261120   ;;  %s405_s12 = sand.u32 1, %s1461_s14  }
  0x57   : > { %v414_v0 = vld [vmem:[%s412_s22] sm:$0xff]  ;;  %v415_v1 = vld [vmem:[%s412_s22 + $0x8] sm:$0xff]  ;;  %vm637_vm6 = vcmp.lt.s32.totalorder %v1685_v47, 15  ;;  %vm721_vm8 = vcmp.lt.s32.totalorder %v1681_v41, 2  ;;  %vm724_vm9 = vcmp.ge.s32.totalorder %v1681_v41, 2  ;;  %vm854_vm10 = vcmp.lt.s32.totalorder %v1681_v41, 6 }
  0x58   : > { %v419_v2 = vsel %vm418_vm0, %v414_v0, 0.0  ;;  %v422_v3 = vsel %vm418_vm0, %v415_v1, 0.0  ;;  %vm858_vm11 = vcmp.lt.s32.totalorder %v1685_v47, 14  ;;  %s1086_s25 = sshll.u32 %s405_s12, 4  ;;  %s1121_s28 = sshll.u32 %s1560_s17, 8 }
  0x59   : > { %420 = vadd.xlane.f32.xlu0 %v419_v2  ;;  %v1279_v2 = vld [vmem:[%s1801_s7] sm:$0xff]   ;;  %s407_s27 = scalar_lea.vmem [#allocation10], %s1086_s25  ;;  %s1749_s15 = scalar_lea.hbm %s1804_s10, %s1121_s28 }
  0x5a   : > { %s971_s20 = sshll.u32 %s407_s27, 4  ;;  %s1754_s17 = scalar_lea.sflag [#allocation4], %s405_s12  ;;  %s1751_s20 = int_to_ptr.vmem [resolvable:$true] %s971_s20 }
  0x5b   : > { %s1397_s30 = scalar_lea.vmem %s1751_s20, 256  ;;  %s1481_s26 = smov [#allocation10]  }
  0x5c   : > { %p1398_p2 = scmp.ne.s32.totalorder %s1751_s20, %s1397_s30  ;;  %s1401_s29 = sshll.u32 %s1481_s26, 4  ;;  %s1402_s29 = int_to_ptr.vmem [resolvable:$false] %s1401_s29 }
  0x5d   : > { %423 = vadd.xlane.f32.xlu0 %v422_v3  ;;  %s1403_s11 = scalar_lea.vmem %s1402_s29, 512  ;;  %p1404_p6 = scmp.lt.s32.totalorder %s1751_s20, %s1402_s29 }
  0x5e   : > { %p1399_p4 = pnand %p1398_p2, %p1577_p5  ;;  %p1405_p8 = scmp.lt.s32.totalorder %s1403_s11, %s1397_s30 }
  0x60   : > { %p1400_p7 = pneg %p1399_p4  ;;  %p1406_p11 = por %p1405_p8, %p1404_p6 }
  0x62   : > { %p1407_p0 = pnand %p1406_p11, %p1400_p7 }
  0xe2   : > { %v421_v4 = vpop.xlane.xlu0 %420 }
  0xe3   : > { %v426_v5 = vmul.f32 0.25, %v421_v4 }
  0xe5   : > { %v428_v6 = vsub.f32 %v414_v0, %v426_v5  ;;  %v1277_v0 = vld [vmem:[%s1801_s7 + $0x8] sm:$0xff]  }
  0xe6   : > { %v424_v7 = vpop.xlane.xlu0 %423 }
  0xe7   : > { %v427_v8 = vmul.f32 0.25, %v424_v7  ;;  %v430_v9 = vmul.f32 %v428_v6, %v428_v6 }
  0xe9   : > { %v429_v10 = vsub.f32 %v415_v1, %v427_v8  ;;  %v432_v11 = vsel %vm418_vm0, %v430_v9, 0.0  ;;  %v1276_v1 = vld [vmem:[%s1801_s7 + $0x10] sm:$0xff]  }
  0xea   : > { %433 = vadd.xlane.f32.xlu1 %v432_v11  ;;  %v1096_v11 = vld [vmem:[#allocation7] ss:$0 sm:$0xff] }
  0xeb   : > { %v431_v12 = vmul.f32 %v429_v10, %v429_v10 }
  0xed   : > { %v435_v13 = vsel %vm418_vm0, %v431_v12, 0.0 }
  0xee   : > { %436 = vadd.xlane.f32.xlu1 %v435_v13 }
 0x173   : > { %v434_v17 = vpop.xlane.xlu1 %433 }
 0x174   : > { %v438_v18 = vmul.f32 0.25, %v434_v17 }
 0x176   : > { %v440_v19 = vadd.f32 1e-05, %v438_v18 }
 0x177   : > { %v437_v20 = vpop.xlane.xlu1 %436 }
 0x178   : > { %1281 = vrsqrt.f32 %v440_v19  ;;  %v439_v21 = vmul.f32 0.25, %v437_v20 }
 0x17a   : > { %v441_v22 = vadd.f32 1e-05, %v439_v21 }
 0x17c   : > { %1283 = vrsqrt.f32 %v441_v22 }
 0x185   : > { %v1282_v23 = vpop.eup %1281 }
 0x186   : > { %v444_v24 = vmul.f32 %v1282_v23, %v428_v6 }
 0x188   : > { %v452_v28 = vmul.f32 %v1089_v25, %v444_v24 }
 0x189   : > { %v1284_v26 = vpop.eup %1283 }
 0x18a   : > { %v445_v27 = vmul.f32 %v1284_v26, %v429_v10  ;;  %v460_v31 = vadd.f32 %v1090_v29, %v452_v28 }
 0x18c   : > { %v453_v30 = vmul.f32 %v1089_v25, %v445_v27 }
 0x18e   : > { %v461_v32 = vadd.f32 %v1090_v29, %v453_v30 }
 0x190   : > { %v462_v33 = vpack.c.bf16 %v461_v32, %v460_v31 }
 0x192   : > { %1142 = vmatmul.mubr.msk.bf16.vlgmr.msra.gmra.mxu0 %vm418_vm0, %v462_v33 }
 0x193   : > { %1153 = vmatprep.mubr.msk.bf16.mxu0 %vm1480_vm2, %v1479_v15  ;;  %1152 = vmatpush3.bf16.msra.mxu0 %v588_v37 }
 0x194   : > { %1163 = vmatprep.subr.bf16.mxu0 %v1479_v15 }
 0x252   : > { %v512_v40 = vpop.f32.mrf.mxu0 }
 0x253   : > { %v513_v42 = vadd.f32 %v1091_v39, %v512_v40 }
 0x254   : > { %v1143_v43 = vpop.f32.mrf.mxu0 }
 0x255   : > { %v520_v48 = vrot.slane %v513_v42, 7  ;;  %v631_v51 = vrot.slane %v513_v42, 1 }
 0x256   : > { %v515_v45 = vpop.f32.mrf.mxu0 }
 0x257   : > { %v516_v46 = vadd.f32 %v1091_v39, %v515_v45 }
 0x258   : > { %v1144_v49 = vpop.f32.mrf.mxu0 }
 0x259   : > { %v521_v52 = vrot.slane %v516_v46, 7  ;;  %v534_v53 = vpack.c.bf16 %v516_v46, %v513_v42  ;;  %v632_v54 = vrot.slane %v516_v46, 1  ;;  %v1278_v42 = vld [vmem:[%s1801_s7 + $0x28] sm:$0xff]  }
 0x25b   : > { %v525_v55 = vsel %vm524_vm3, %v520_v48, %v521_v52  ;;  %v526_v56 = vsel %vm524_vm3, %v521_v52, %v520_v48  ;;  %v635_v57 = vsel %vm633_vm5, %v632_v54, %v631_v51  ;;  %1148 = vmatmul.mubr.msk.bf16.vlgmr.msra.gmra.mxu1 %vm418_vm0, %v534_v53  ;;  %v634_v60 = vsel %vm633_vm5, %v631_v51, %v632_v54  ;;  %v1280_v53 = vld [vmem:[%s1801_s7 + $0x20] sm:$0xff]  }
 0x25c   : > { %v530_v58 = vsel %vm528_vm4, %v526_v56, 0.0  ;;  %1158 = vmatpush3.bf16.msra.mxu1 %v647_v50  ;;  %1159 = vmatprep.mubr.msk.bf16.mxu1 %vm1480_vm2, %v1479_v15  ;;  %v639_v61 = vsel %vm637_vm6, %v635_v57, 0.0 }
 0x25d   : > { %v532_v59 = vpack.c.bf16 %v525_v55, %v530_v58  ;;  %1171 = vmatprep.subr.bf16.mxu1 %v1479_v15  ;;  %v640_v62 = vpack.c.bf16 %v639_v61, %v634_v60 }
 0x25f   : > { %1154 = vmatmul.mubr.msk.bf16.vlgmr.msra.gmra.mxu0 %vm418_vm0, %v532_v59 }
 0x260   : > { %1167 = vmatprep.mubr.msk.bf16.mxu0 %vm1480_vm2, %v1479_v15  ;;  %1164 = vmatpush3.bf16.msra.mxu0 %v1275_v63 }
 0x261   : > { %1165 = vmatprep.subr.bf16.mxu0 %v1479_v15 }
 0x263   : > { %1160 = vmatmul.mubr.msk.bf16.vlgmr.msra.gmra.mxu1 %vm418_vm0, %v640_v62 }
 0x264   : > { %1175 = vmatprep.mubr.msk.bf16.mxu1 %vm1480_vm2, %v1479_v15  ;;  %1172 = vmatpush3.bf16.msra.mxu1 %v1277_v0 }
 0x265   : > { %1173 = vmatprep.subr.bf16.mxu1 %v1479_v15  ;;  %1166 = vmatpush3.bf16.msra.mxu0 %v1276_v1 }
 0x266   : > { %1179 = vmatprep.subr.bf16.mxu0 %v1479_v15 }
 0x268   : > { %1174 = vmatpush3.bf16.msra.mxu1 %v1279_v2 }
 0x31b   : > { %v577_v3 = vpop.f32.mrf.mxu1 }
 0x31d   : > { %v1149_v4 = vpop.f32.mrf.mxu1 }
 0x31f   : > { %v580_v5 = vpop.f32.mrf.mxu1  ;;  %v624_v6 = vpop.f32.mrf.mxu0 }
 0x320   : > { %v625_v9 = vadd.f32 %v624_v6, %v577_v3 }
 0x321   : > { %v1150_v7 = vpop.f32.mrf.mxu1  ;;  %v1155_v8 = vpop.f32.mrf.mxu0 }
 0x323   : > { %v627_v10 = vpop.f32.mrf.mxu0  ;;  %v683_v12 = vpop.f32.mrf.mxu1 }
 0x324   : > { %v690_v13 = vadd.f32 %v683_v12, %v625_v9  ;;  %v628_v17 = vadd.f32 %v627_v10, %v580_v5 }
 0x325   : > { %v1156_v14 = vpop.f32.mrf.mxu0  ;;  %v1161_v16 = vpop.f32.mrf.mxu1 }
 0x326   : > { %v698_v18 = vadd.f32 %v1096_v11, %v690_v13 }
 0x327   : > { %v686_v19 = vpop.f32.mrf.mxu1 }
 0x328   : > { %v702_v20 = vmul.f32 0.044715, %v698_v18  ;;  %v691_v21 = vadd.f32 %v686_v19, %v628_v17  ;;  %v700_v35 = vmul.f32 0.5, %v698_v18 }
 0x329   : > { %v1162_v22 = vpop.f32.mrf.mxu1 }
 0x32a   : > { %v704_v23 = vmul.f32 %v702_v20, %v698_v18  ;;  %v699_v24 = vadd.f32 %v1096_v11, %v691_v21 }
 0x32c   : > { %v706_v25 = vmul.f32 %v704_v23, %v698_v18  ;;  %v703_v26 = vmul.f32 0.044715, %v699_v24  ;;  %v701_v38 = vmul.f32 0.5, %v699_v24 }
 0x32e   : > { %v708_v27 = vadd.f32 %v706_v25, %v698_v18  ;;  %v705_v28 = vmul.f32 %v703_v26, %v699_v24 }
 0x330   : > { %v710_v29 = vmul.f32 0.7978846, %v708_v27  ;;  %v707_v30 = vmul.f32 %v705_v28, %v699_v24 }
 0x332   : > { %1285 = vtanh.f32 %v710_v29  ;;  %v709_v31 = vadd.f32 %v707_v30, %v699_v24  ;;  %v951_v24 = vld [vmem:[#allocation8] sm:$0xff]  ;;  %v952_v30 = vld [vmem:[#allocation8 + $0x8] sm:$0xff] }
 0x334   : > { %v711_v32 = vmul.f32 0.7978846, %v709_v31 }
 0x336   : > { %1287 = vtanh.f32 %v711_v32 }
 0x33f   : > { %v1286_v33 = vpop.eup %1285 }
 0x340   : > { %v714_v34 = vadd.f32 1.0, %v1286_v33 }
 0x342   : > { %v716_v37 = vmul.f32 %v714_v34, %v700_v35 }
 0x343   : > { %v1288_v36 = vpop.eup %1287 }
 0x344   : > { %v715_v39 = vadd.f32 1.0, %v1288_v36  ;;  %v719_v43 = vrot.slane %v716_v37, 6  ;;  %v852_v46 = vrot.slane %v716_v37, 2 }
 0x346   : > { %v717_v40 = vmul.f32 %v715_v39, %v701_v38 }
 0x348   : > { %v733_v44 = vpack.c.bf16 %v717_v40, %v716_v37  ;;  %v720_v45 = vrot.slane %v717_v40, 6  ;;  %v853_v48 = vrot.slane %v717_v40, 2 }
 0x34a   : > { %1168 = vmatmul.mubr.msk.bf16.vlgmr.msra.gmra.mxu0 %vm751_vm7, %v733_v44  ;;  %v722_v49 = vsel %vm721_vm8, %v719_v43, %v720_v45  ;;  %v723_v50 = vsel %vm721_vm8, %v720_v45, %v719_v43  ;;  %v856_v51 = vsel %vm854_vm10, %v853_v48, %v852_v46  ;;  %v855_v55 = vsel %vm854_vm10, %v852_v46, %v853_v48 }
 0x34b   : > { %1180 = vmatpush3.bf16.msra.mxu0 %v1278_v42  ;;  %v726_v52 = vsel %vm724_vm9, %v723_v50, 0.0  ;;  %1183 = vmatprep.mubr.msk.bf16.mxu0 %vm1480_vm2, %v1479_v15  ;;  %v860_v56 = vsel %vm858_vm11, %v856_v51, 0.0 }
 0x34c   : > { %1181 = vmatprep.subr.bf16.mxu0 %v1479_v15  ;;  %v728_v54 = vpack.c.bf16 %v722_v49, %v726_v52  ;;  %v861_v47 = vpack.c.bf16 %v860_v56, %v855_v55  ;;  %v1114_v15 = vld [vmem:[%s1802_s8] ss:$0 sm:$0xff] }
 0x34e   : > { %1176 = vmatmul.mubr.msk.bf16.vlgmr.msra.gmra.mxu1 %vm751_vm7, %v728_v54 }
 0x34f   : > { %1182 = vmatpush3.bf16.msra.mxu0 %v1280_v53 }
 0x352   : > { %1184 = vmatmul.mubr.msk.bf16.vlgmr.msra.gmra.mxu0 %vm751_vm7, %v861_v47 }
 0x40a   : > { %v789_v57 = vpop.f32.mrf.mxu0 }
 0x40c   : > { %v1169_v58 = vpop.f32.mrf.mxu0 }
 0x40e   : > { %v792_v59 = vpop.f32.mrf.mxu0  ;;  %v845_v60 = vpop.f32.mrf.mxu1 }
 0x40f   : > { %v846_v63 = vadd.f32 %v845_v60, %v789_v57 }
 0x410   : > { %v1170_v61 = vpop.f32.mrf.mxu0  ;;  %v1177_v62 = vpop.f32.mrf.mxu1 }
 0x412   : > { %v848_v0 = vpop.f32.mrf.mxu1  ;;  %v916_v41 = vpop.f32.mrf.mxu0 }
 0x413   : > { %v923_v1 = vadd.f32 %v916_v41, %v846_v63  ;;  %v849_v4 = vadd.f32 %v848_v0, %v792_v59 }
 0x414   : > { %v1178_v2 = vpop.f32.mrf.mxu1  ;;  %v1185_v3 = vpop.f32.mrf.mxu0 }
 0x415   : > { %v931_v5 = vadd.f32 %v1114_v15, %v923_v1 }
 0x416   : > { %v919_v6 = vpop.f32.mrf.mxu0 }
 0x417   : > { %v935_v7 = vmul.f32 0.044715, %v931_v5  ;;  %v924_v8 = vadd.f32 %v919_v6, %v849_v4  ;;  %v933_v22 = vmul.f32 0.5, %v931_v5 }
 0x418   : > { %v1186_v9 = vpop.f32.mrf.mxu0 }
 0x419   : > { %v937_v10 = vmul.f32 %v935_v7, %v931_v5  ;;  %v932_v11 = vadd.f32 %v1114_v15, %v924_v8 }
 0x41b   : > { %v939_v12 = vmul.f32 %v937_v10, %v931_v5  ;;  %v936_v13 = vmul.f32 0.044715, %v932_v11  ;;  %v934_v28 = vmul.f32 0.5, %v932_v11 }
 0x41d   : > { %v941_v14 = vadd.f32 %v939_v12, %v931_v5  ;;  %v938_v16 = vmul.f32 %v936_v13, %v932_v11 }
 0x41f   : > { %v943_v17 = vmul.f32 0.7978846, %v941_v14  ;;  %v940_v18 = vmul.f32 %v938_v16, %v932_v11 }
 0x421   : > { %1289 = vtanh.f32 %v943_v17  ;;  %v942_v19 = vadd.f32 %v940_v18, %v932_v11 }
 0x423   : > { %v944_v20 = vmul.f32 0.7978846, %v942_v19 }
 0x425   : > { %1291 = vtanh.f32 %v944_v20 }
 0x42e   : > { %v1290_v21 = vpop.eup %1289 }
 0x42f   : > { %v947_v23 = vadd.f32 1.0, %v1290_v21 }
 0x431   : > { %v949_v25 = vmul.f32 %v947_v23, %v933_v22 }
 0x432   : > { %v1292_v26 = vpop.eup %1291 }
 0x433   : > { %v953_v27 = vadd.f32 %v951_v24, %v949_v25  ;;  %v948_v29 = vadd.f32 1.0, %v1292_v26 }
 0x435   : > { %v950_v31 = vmul.f32 %v948_v29, %v934_v28  ;;  %955 = vst.msk [vmem:[%s407_s27] sm:$0xff] %vm751_vm7, %v953_v27 }
 0x437   : > { %v954_v32 = vadd.f32 %v952_v30, %v950_v31 }
 0x439   : > { %956 = vst.msk [vmem:[%s407_s27 + $0x8] sm:$0xff] %vm751_vm7, %v954_v32 }
 0x43a   : > { %1410 = shalt.err (!%p1407_p0)
}
 0x43b   : > { %s1411_s18 = scalar_lea.hbm %s1749_s15, 256  ;;  %s1415_s28 = scalar_lea.hbm %s1804_s10, 512 }
 0x43c   : > { %p1412_p13 = scmp.ne.s32.totalorder %s1749_s15, %s1411_s18  ;;  %p1416_p3 = scmp.lt.s32.totalorder %s1749_s15, %s1804_s10 }
 0x43d   : > { %p1417_p12 = scmp.lt.s32.totalorder %s1415_s28, %s1411_s18 }
 0x43e   : > { %p1413_p9 = pnand %p1412_p13, %p1577_p5 }
 0x43f   : > { %p1418_p10 = por %p1417_p12, %p1416_p3 }
 0x440   : > { %p1414_p1 = pneg %p1413_p9 }
 0x442   : > { %p1419_p2 = pnand %p1418_p10, %p1414_p1 }
 0x444   : > { %1422 = shalt.err (!%p1419_p2)
}
 0x445   : > { %s1482_s21 = smov 128   ;;  %s1483_s30 = smov 8  }
 0x446   : > { %1203 = dma.vmem_to_hbm [thread:$0]  (%p1577_p5), %s1751_s20, 256, %s1749_s15, %s1754_s17, %s1482_s21, %s1482_s21, %s1483_s30  }
 0x447 PF: > { %p1230_p4 = scmp.ge.s32.totalorder %s1469_s16, 2  ;;  %s986_s26 = sand.u32 1, %s1457_s13  }
 0x448   : > { %p1819_p7 = scmp.ne.s32.totalorder %s1810_s24, 0  ;;  %s987_s29 = scalar_lea.sflag [#allocation4], %s986_s26 }
 0x44a   : > { %p1219_p6 = pnand %p1230_p4, %p1819_p7 }
 0x44c   : > { %p1220_p8 = pneg %p1219_p6 }
 0x44e   : > { %1452 = dma.done.wait (%p1220_p8), %s987_s29, 256  }
 0x44f   : > { %1454 = vsyncadd (%p1220_p8), %s987_s29, 4294967040  ;;  %s1820_s11 = sld [smem:[#allocation15_spill]]  ;;  %p23_p11 = scmp.ge.s32.totalorder %s1564_s19, 4  }
 0x450   : > { %s1821_s15 = sld [smem:[#allocation16_spill]]  ;;  %s1822_s13 = smov %s1461_s14 }
 0x451   : > { %s1824_s16 = smov %s1564_s19  ;;  %25 = sbr.rel (!%p23_p11) target bundleno = 6 (0x6), region = 116 }
 0x455   : > { %s1823_s14 = smov %s1820_s11 }
 0x456   :  { %992 = vsyncpa [#allocation3], 1 }
 0x457   :  { %994 = vsyncpa [#allocation3 + $0x1], 1 }
 0x458   :  { %995 = vsyncpa [#allocation6], 1 }
 0x459   :  { %996 = vsyncpa [#allocation9], 1 }
 0x45a   :  { %997 = vsyncpa [#allocation4], 1 }
 0x45b   :  { %999 = vsyncpa [#allocation4 + $0x1], 1 }

// kernel: tpu_custom_call.1
= control target key start
LH: loop header
LB: loop body
LE: loop exit
PB: predicated region body
PF: predicated region fallthrough
CT: control target
= control target key end

     0   :  { %15 = vsyncpa [#allocation3], 0  ;;  %s1794_s0 = inlined_call_operand.vmem [shape: f32[2,16,4], index: 0, kind: input, shape index: {}]   ;;  %s1795_s1 = inlined_call_operand.vmem [shape: f32[1,4], index: 1, kind: input, shape index: {}]   ;;  %s1796_s2 = inlined_call_operand.vmem [shape: f32[1,4], index: 2, kind: input, shape index: {}]   ;;  %s1797_s3 = inlined_call_operand.vmem [shape: bf16[4,4], index: 3, kind: input, shape index: {}]   ;;  %s1798_s4 = inlined_call_operand.hbm [shape: f32[1,4], index: 4, kind: input, shape index: {}]   ;;  %s1799_s5 = inlined_call_operand.hbm [shape: bf16[3,4,32], index: 5, kind: input, shape index: {}]   ;;  %s1800_s6 = inlined_call_operand.hbm [shape: f32[1,32], index: 6, kind: input, shape index: {}]   ;;  %s1801_s7 = inlined_call_operand.vmem [shape: bf16[3,32,32], index: 7, kind: input, shape index: {}]   ;;  %s1802_s8 = inlined_call_operand.vmem [shape: f32[1,32], index: 8, kind: input, shape index: {}]   ;;  %s1803_s9 = inlined_call_operand.hbm [shape: f32[16,32], index: 9, kind: input, shape index: {}]   ;;  %s1804_s10 = inlined_call_operand.hbm [shape: f32[2,16,32], index: 10, kind: output, shape index: {}]  }
   0x1   :  { %16 = vsyncpa [#allocation6], 0 }
   0x2   :  { %17 = vsyncpa [#allocation9], 0 }
   0x3   :  { %18 = vsyncpa [#allocation4], 0 }
   0x4   :  { %20 = vsyncpa [#allocation4 + $0x1], 0  ;;  %s1539_s13 = smov 0   ;;  %s1541_s14 = smov 0  }
   0x5   :  { %s1543_s15 = smov 0   ;;  %s1545_s16 = smov 0  }
   0x6 LB: > { %1807 = sst [smem:[#allocation15_spill]] %s1465_s15  ;;  %s1560_s17 = sadd.s32 4294967295, %s1469_s16   ;;  %s1469_s16 = sphi %s1545_s16, %s1824_s16   ;;  %s1465_s15 = sphi %s1543_s15, %s1821_s15   ;;  %s1461_s14 = sphi %s1541_s14, %s1823_s14   ;;  %s1457_s13 = sphi %s1539_s13, %s1822_s13  }
   0x7   : > { %s1074_s18 = sadd.s32 4294967294, %s1469_s16   ;;  %s1564_s19 = sadd.s32 1, %s1469_s16  }
   0x8   : > { %s248_s20 = sadd.s32 1, %s1465_s15  ;;  %s245_s21 = ssub.s32 %s1469_s16, %s1564_s19 }
   0x9   : > { %p258_p0 = scmp.ne.s32.totalorder %s1465_s15, %s1461_s14  ;;  %p246_p1 = scmp.eq.s32.totalorder %s245_s21, 0 }
   0xa   : > { %p259_p2 = scmp.eq.s32.totalorder %s1560_s17, 1  ;;  %p264_p3 = scmp.ne.s32.totalorder %s1461_s14, %s1457_s13 }
   0xb   : > { %p265_p4 = scmp.eq.s32.totalorder %s1074_s18, 1  ;;  %p1075_p7 = scmp.ge.s32.totalorder %s1469_s16, 1 }
   0xc   : > { %s1575_s22 = scalar_select %p246_p1, %s1465_s15, %s248_s20  }
   0xd   : > { %p1577_p5 = por %p259_p2, %p258_p0  ;;  %p1581_p6 = por %p265_p4, %p264_p3 }
   0xe   : > { %1808 = sst [smem:[#allocation16_spill]] %s1575_s22  ;;  %p272_p8 = scmp.lt.s32.totalorder %s1469_s16, 3 }
   0xf   : > { %s1810_s24 = scalar_select %p1581_p6, 1, 0 }
  0x10   : > { %p1805_p9 = scmp.eq.s32.totalorder %s1560_s17, 0  ;;  %p1588_p10 = pnand %p1075_p7, %p272_p8 }
  0x11   : > { %s1471_s26 = smov [#allocation5]   ;;  %s1472_s29 = smov [#allocation2]  }
  0x12   : > { %s304_s27 = sshll.u32 %s1471_s26, 4  ;;  %p1205_p11 = pneg %p1588_p10  ;;  %s305_s27 = int_to_ptr.vmem [resolvable:$true] %s304_s27 }
  0x13   : > { %s294_s30 = sshll.u32 %s1472_s29, 4  ;;  %s1473_s11 = smov [#allocation7]   ;;  %s295_s30 = int_to_ptr.vmem [resolvable:$true] %s294_s30 }
  0x14   : > { %p1596_p12 = pnand %p1805_p9, %p1205_p11  ;;  %s318_s12 = sshll.u32 %s1473_s11, 4  ;;  %s319_s12 = int_to_ptr.vmem [resolvable:$true] %s318_s12 }
  0x15   : > { %s1304_s18 = scalar_lea.vmem %s305_s27, 96  ;;  %p1312_p3 = scmp.lt.s32.totalorder %s305_s27, %s305_s27 }
  0x16   : > { %p1295_p13 = pneg %p1596_p12  ;;  %p1305_p0 = scmp.ne.s32.totalorder %s305_s27, %s1304_s18 }
  0x17   : > { %p1313_p4 = scmp.lt.s32.totalorder %s1304_s18, %s1304_s18 }
  0x18   : > { %p1307_p1 = pnand %p1305_p0, %p1295_p13 }
  0x19   : > { %p1314_p7 = por %p1313_p4, %p1312_p3 }
  0x1a   : > { %p1308_p2 = pneg %p1307_p1 }
  0x1c   : > { %p1315_p8 = pnand %p1314_p7, %p1308_p2 }
  0x1e   : > { %1318 = shalt.err (!%p1315_p8)
}
  0x1f   : > { %s1474_s20 = smov 32   ;;  %s1475_s21 = smov 2  }
  0x20   : > { %1211 = dma.hbm_to_vmem [thread:$0]  (!%p1596_p12), %s1799_s5, 96, %s305_s27, [#allocation6], %s1474_s20, %s1474_s20, %s1475_s21  }
  0x21   : > { %s1330_s11 = scalar_lea.vmem %s295_s30, 16  ;;  %s1337_s22 = scalar_lea.vmem %s295_s30, 32 }
  0x22   : > { %p1331_p11 = scmp.ne.s32.totalorder %s295_s30, %s1330_s11  ;;  %p1338_p9 = scmp.lt.s32.totalorder %s295_s30, %s295_s30 }
  0x23   : > { %p1339_p3 = scmp.lt.s32.totalorder %s1337_s22, %s1330_s11 }
  0x24   : > { %p1333_p0 = pnand %p1331_p11, %p1295_p13 }
  0x25   : > { %p1340_p2 = por %p1339_p3, %p1338_p9 }
  0x26   : > { %p1334_p1 = pneg %p1333_p0 }
  0x28   : > { %p1341_p4 = pnand %p1340_p2, %p1334_p1 }
  0x2a   : > { %1344 = shalt.err (!%p1341_p4)
}
  0x2b   : > { %1208 = dma.hbm_to_vmem [thread:$0]  (!%p1596_p12), %s1798_s4, 16, %s295_s30, [#allocation3]  }
  0x2c   : > { %s1356_s27 = scalar_lea.vmem %s319_s12, 16  ;;  %s1363_s20 = scalar_lea.vmem %s319_s12, 32 }
  0x2d   : > { %p1357_p7 = scmp.ne.s32.totalorder %s319_s12, %s1356_s27  ;;  %p1364_p0 = scmp.lt.s32.totalorder %s319_s12, %s319_s12 }
  0x2e   : > { %p1365_p6 = scmp.lt.s32.totalorder %s1363_s20, %s1356_s27 }
  0x2f   : > { %p1359_p8 = pnand %p1357_p7, %p1295_p13 }
  0x30   : > { %p1366_p9 = por %p1365_p6, %p1364_p0 }
  0x31   : > { %p1360_p11 = pneg %p1359_p8 }
  0x33   : > { %p1367_p1 = pnand %p1366_p9, %p1360_p11 }
  0x35   : > { %1370 = shalt.err (!%p1367_p1)
}
  0x36   : > { %1214 = dma.hbm_to_vmem [thread:$0]  (!%p1596_p12), %s1800_s6, 16, %s319_s12, [#allocation6]  }
  0x37   : > { %s1476_s15 = smov [#allocation8]  }
  0x38   : > { %s334_s30 = sshll.u32 %s1476_s15, 4  ;;  %s335_s30 = int_to_ptr.vmem [resolvable:$true] %s334_s30 }
  0x39   : > { %s1382_s26 = scalar_lea.vmem %s335_s30, 256  ;;  %p1390_p7 = scmp.lt.s32.totalorder %s335_s30, %s335_s30 }
  0x3a   : > { %p1383_p3 = scmp.ne.s32.totalorder %s335_s30, %s1382_s26  ;;  %p1391_p6 = scmp.lt.s32.totalorder %s1382_s26, %s1382_s26 }
  0x3c   : > { %p1385_p2 = pnand %p1383_p3, %p1295_p13  ;;  %p1392_p8 = por %p1391_p6, %p1390_p7 }
  0x3e   : > { %p1386_p4 = pneg %p1385_p2 }
  0x40   : > { %p1393_p11 = pnand %p1392_p8, %p1386_p4 }
  0x42   : > { %1396 = shalt.err (!%p1393_p11)
}
  0x43   : > { %s1477_s29 = smov 128   ;;  %s1478_s11 = smov 8  }
  0x44   : > { %1217 = dma.hbm_to_vmem [thread:$0]  (!%p1596_p12), %s1803_s9, 256, %s335_s30, [#allocation9], %s1477_s29, %s1477_s29, %s1478_s11  }
  0x45   : > { %358 = sbr.rel (%p1588_p10) target bundleno = 1095 (0x447), region = 60  ;;  %p1813_p0 = scmp.eq.s32.totalorder (!%p1588_p10), %s1560_s17, 0 }
  0x4a   : > { %1440 = dma.done.wait (%p1813_p0), [#allocation3], 16   ;;  %p1814_p13 = pmov %p1813_p0 }
  0x4b   : > { %p1815_p9 = pmov %p1813_p0 }
  0x4c   : > { %1442 = vsyncadd (%p1814_p13), [#allocation3], 4294967280 }
  0x4d   : > { %1444 = dma.done.wait (%p1815_p9), [#allocation6], 112   ;;  %p1816_p1 = pmov %p1813_p0 }
  0x4e   : > { %p1817_p3 = pmov %p1813_p0 }
  0x4f   : > { %1446 = vsyncadd (%p1816_p1), [#allocation6], 4294967184 }
  0x50   : > { %1448 = dma.done.wait (%p1817_p3), [#allocation9], 256   ;;  %p1818_p12 = pmov %p1813_p0 }
  0x51   : > { %p408_p10 = scmp.lt.s32.totalorder %s1560_s17, 1  ;;  %vm418_vm0 = vcmask 31744   ;;  %v463_v14 = vld [vmem:[%s1797_s3] sm:$0x3]  ;;  %vm474_vm1 = vcmask 1041408   ;;  %v1479_v15 = vmov 0.0   ;;  %v522_v38 = vlaneseq }
  0x52   : > { %1450 = vsyncadd (%p1818_p12), [#allocation9], 4294967040  ;;  %1139 = vmatprep.subr.bf16.mxu0 %v1479_v15  ;;  %v476_v16 = vsel %vm474_vm1, %v463_v14, 0  ;;  %vm1480_vm2 = vmmov 0   ;;  %1145 = vmatprep.subr.bf16.mxu1 %v1479_v15  ;;  %v1089_v25 = vld [vmem:[%s1795_s1] ss:$0 sm:$0xff] }
  0x53   : > { %s409_s25 = scalar_select %p408_p10, %s1560_s17, 1  ;;  %1141 = vmatprep.mubr.msk.bf16.mxu0 %vm1480_vm2, %v1479_v15  ;;  %1140 = vmatpush3.bf16.msra.mxu0 %v476_v16  ;;  %v1090_v29 = vld [vmem:[%s1796_s2] ss:$0 sm:$0xff]  ;;  %v536_v34 = vld [vmem:[#allocation5 + $0x2] sm:$0x3]  ;;  %v1681_v41 = vshrl.u32 %v522_v38, 7 }
  0x54   : > { %1151 = vmatprep.subr.bf16.mxu0 %v1479_v15  ;;  %1147 = vmatprep.mubr.msk.bf16.mxu1 %vm1480_vm2, %v1479_v15  ;;  %v541_v35 = vsel %vm474_vm1, %v536_v34, 0  ;;  %v533_v36 = vld [vmem:[#allocation5] sm:$0x3]  ;;  %v1091_v39 = vld [vmem:[#allocation2] ss:$0 sm:$0xff]  ;;  %v1275_v63 = vld [vmem:[%s1801_s7 + $0x18] sm:$0xff]  }
  0x55   : > { %s1120_s28 = sshll.u32 %s409_s25, 4  ;;  %1146 = vmatpush3.bf16.msra.mxu1 %v541_v35  ;;  %v588_v37 = vsel %vm474_vm1, %v533_v36, 0  ;;  %v642_v44 = vld [vmem:[#allocation5 + $0x4] sm:$0x3]  ;;  %vm524_vm3 = vcmp.lt.s32.totalorder %v1681_v41, 1  ;;  %v1685_v47 = vadd.s32 8, %v1681_v41 }
  0x56   : > { %s412_s22 = scalar_lea.vmem %s1794_s0, %s1120_s28  ;;  %1157 = vmatprep.subr.bf16.mxu1 %v1479_v15  ;;  %vm528_vm4 = vcmp.ge.s32.totalorder %v1681_v41, 1  ;;  %vm633_vm5 = vcmp.lt.s32.totalorder %v1681_v41, 7  ;;  %v647_v50 = vsel %vm474_vm1, %v642_v44, 0  ;;  %vm751_vm7 = vcmask 261120   ;;  %s405_s12 = sand.u32 1, %s1461_s14  }
  0x57   : > { %v414_v0 = vld [vmem:[%s412_s22] sm:$0xff]  ;;  %v415_v1 = vld [vmem:[%s412_s22 + $0x8] sm:$0xff]  ;;  %vm637_vm6 = vcmp.lt.s32.totalorder %v1685_v47, 15  ;;  %vm721_vm8 = vcmp.lt.s32.totalorder %v1681_v41, 2  ;;  %vm724_vm9 = vcmp.ge.s32.totalorder %v1681_v41, 2  ;;  %vm854_vm10 = vcmp.lt.s32.totalorder %v1681_v41, 6 }
  0x58   : > { %v419_v2 = vsel %vm418_vm0, %v414_v0, 0.0  ;;  %v422_v3 = vsel %vm418_vm0, %v415_v1, 0.0  ;;  %vm858_vm11 = vcmp.lt.s32.totalorder %v1685_v47, 14  ;;  %s1086_s25 = sshll.u32 %s405_s12, 4  ;;  %s1121_s28 = sshll.u32 %s1560_s17, 8 }
  0x59   : > { %420 = vadd.xlane.f32.xlu0 %v419_v2  ;;  %v1279_v2 = vld [vmem:[%s1801_s7] sm:$0xff]   ;;  %s407_s27 = scalar_lea.vmem [#allocation10], %s1086_s25  ;;  %s1749_s15 = scalar_lea.hbm %s1804_s10, %s1121_s28 }
  0x5a   : > { %s971_s20 = sshll.u32 %s407_s27, 4  ;;  %s1754_s17 = scalar_lea.sflag [#allocation4], %s405_s12  ;;  %s1751_s20 = int_to_ptr.vmem [resolvable:$true] %s971_s20 }
  0x5b   : > { %s1397_s30 = scalar_lea.vmem %s1751_s20, 256  ;;  %s1481_s26 = smov [#allocation10]  }
  0x5c   : > { %p1398_p2 = scmp.ne.s32.totalorder %s1751_s20, %s1397_s30  ;;  %s1401_s29 = sshll.u32 %s1481_s26, 4  ;;  %s1402_s29 = int_to_ptr.vmem [resolvable:$false] %s1401_s29 }
  0x5d   : > { %423 = vadd.xlane.f32.xlu0 %v422_v3  ;;  %s1403_s11 = scalar_lea.vmem %s1402_s29, 512  ;;  %p1404_p6 = scmp.lt.s32.totalorder %s1751_s20, %s1402_s29 }
  0x5e   : > { %p1399_p4 = pnand %p1398_p2, %p1577_p5  ;;  %p1405_p8 = scmp.lt.s32.totalorder %s1403_s11, %s1397_s30 }
  0x60   : > { %p1400_p7 = pneg %p1399_p4  ;;  %p1406_p11 = por %p1405_p8, %p1404_p6 }
  0x62   : > { %p1407_p0 = pnand %p1406_p11, %p1400_p7 }
  0xe2   : > { %v421_v4 = vpop.xlane.xlu0 %420 }
  0xe3   : > { %v426_v5 = vmul.f32 0.25, %v421_v4 }
  0xe5   : > { %v428_v6 = vsub.f32 %v414_v0, %v426_v5  ;;  %v1277_v0 = vld [vmem:[%s1801_s7 + $0x8] sm:$0xff]  }
  0xe6   : > { %v424_v7 = vpop.xlane.xlu0 %423 }
  0xe7   : > { %v427_v8 = vmul.f32 0.25, %v424_v7  ;;  %v430_v9 = vmul.f32 %v428_v6, %v428_v6 }
  0xe9   : > { %v429_v10 = vsub.f32 %v415_v1, %v427_v8  ;;  %v432_v11 = vsel %vm418_vm0, %v430_v9, 0.0  ;;  %v1276_v1 = vld [vmem:[%s1801_s7 + $0x10] sm:$0xff]  }
  0xea   : > { %433 = vadd.xlane.f32.xlu1 %v432_v11  ;;  %v1096_v11 = vld [vmem:[#allocation7] ss:$0 sm:$0xff] }
  0xeb   : > { %v431_v12 = vmul.f32 %v429_v10, %v429_v10 }
  0xed   : > { %v435_v13 = vsel %vm418_vm0, %v431_v12, 0.0 }
  0xee   : > { %436 = vadd.xlane.f32.xlu1 %v435_v13 }
 0x173   : > { %v434_v17 = vpop.xlane.xlu1 %433 }
 0x174   : > { %v438_v18 = vmul.f32 0.25, %v434_v17 }
 0x176   : > { %v440_v19 = vadd.f32 1e-05, %v438_v18 }
 0x177   : > { %v437_v20 = vpop.xlane.xlu1 %436 }
 0x178   : > { %1281 = vrsqrt.f32 %v440_v19  ;;  %v439_v21 = vmul.f32 0.25, %v437_v20 }
 0x17a   : > { %v441_v22 = vadd.f32 1e-05, %v439_v21 }
 0x17c   : > { %1283 = vrsqrt.f32 %v441_v22 }
 0x185   : > { %v1282_v23 = vpop.eup %1281 }
 0x186   : > { %v444_v24 = vmul.f32 %v1282_v23, %v428_v6 }
 0x188   : > { %v452_v28 = vmul.f32 %v1089_v25, %v444_v24 }
 0x189   : > { %v1284_v26 = vpop.eup %1283 }
 0x18a   : > { %v445_v27 = vmul.f32 %v1284_v26, %v429_v10  ;;  %v460_v31 = vadd.f32 %v1090_v29, %v452_v28 }
 0x18c   : > { %v453_v30 = vmul.f32 %v1089_v25, %v445_v27 }
 0x18e   : > { %v461_v32 = vadd.f32 %v1090_v29, %v453_v30 }
 0x190   : > { %v462_v33 = vpack.c.bf16 %v461_v32, %v460_v31 }
 0x192   : > { %1142 = vmatmul.mubr.msk.bf16.vlgmr.msra.gmra.mxu0 %vm418_vm0, %v462_v33 }
 0x193   : > { %1153 = vmatprep.mubr.msk.bf16.mxu0 %vm1480_vm2, %v1479_v15  ;;  %1152 = vmatpush3.bf16.msra.mxu0 %v588_v37 }
 0x194   : > { %1163 = vmatprep.subr.bf16.mxu0 %v1479_v15 }
 0x252   : > { %v512_v40 = vpop.f32.mrf.mxu0 }
 0x253   : > { %v513_v42 = vadd.f32 %v1091_v39, %v512_v40 }
 0x254   : > { %v1143_v43 = vpop.f32.mrf.mxu0 }
 0x255   : > { %v520_v48 = vrot.slane %v513_v42, 7  ;;  %v631_v51 = vrot.slane %v513_v42, 1 }
 0x256   : > { %v515_v45 = vpop.f32.mrf.mxu0 }
 0x257   : > { %v516_v46 = vadd.f32 %v1091_v39, %v515_v45 }
 0x258   : > { %v1144_v49 = vpop.f32.mrf.mxu0 }
 0x259   : > { %v521_v52 = vrot.slane %v516_v46, 7  ;;  %v534_v53 = vpack.c.bf16 %v516_v46, %v513_v42  ;;  %v632_v54 = vrot.slane %v516_v46, 1  ;;  %v1278_v42 = vld [vmem:[%s1801_s7 + $0x28] sm:$0xff]  }
 0x25b   : > { %v525_v55 = vsel %vm524_vm3, %v520_v48, %v521_v52  ;;  %v526_v56 = vsel %vm524_vm3, %v521_v52, %v520_v48  ;;  %v635_v57 = vsel %vm633_vm5, %v632_v54, %v631_v51  ;;  %1148 = vmatmul.mubr.msk.bf16.vlgmr.msra.gmra.mxu1 %vm418_vm0, %v534_v53  ;;  %v634_v60 = vsel %vm633_vm5, %v631_v51, %v632_v54  ;;  %v1280_v53 = vld [vmem:[%s1801_s7 + $0x20] sm:$0xff]  }
 0x25c   : > { %v530_v58 = vsel %vm528_vm4, %v526_v56, 0.0  ;;  %1158 = vmatpush3.bf16.msra.mxu1 %v647_v50  ;;  %1159 = vmatprep.mubr.msk.bf16.mxu1 %vm1480_vm2, %v1479_v15  ;;  %v639_v61 = vsel %vm637_vm6, %v635_v57, 0.0 }
 0x25d   : > { %v532_v59 = vpack.c.bf16 %v525_v55, %v530_v58  ;;  %1171 = vmatprep.subr.bf16.mxu1 %v1479_v15  ;;  %v640_v62 = vpack.c.bf16 %v639_v61, %v634_v60 }
 0x25f   : > { %1154 = vmatmul.mubr.msk.bf16.vlgmr.msra.gmra.mxu0 %vm418_vm0, %v532_v59 }
 0x260   : > { %1167 = vmatprep.mubr.msk.bf16.mxu0 %vm1480_vm2, %v1479_v15  ;;  %1164 = vmatpush3.bf16.msra.mxu0 %v1275_v63 }
 0x261   : > { %1165 = vmatprep.subr.bf16.mxu0 %v1479_v15 }
 0x263   : > { %1160 = vmatmul.mubr.msk.bf16.vlgmr.msra.gmra.mxu1 %vm418_vm0, %v640_v62 }
 0x264   : > { %1175 = vmatprep.mubr.msk.bf16.mxu1 %vm1480_vm2, %v1479_v15  ;;  %1172 = vmatpush3.bf16.msra.mxu1 %v1277_v0 }
 0x265   : > { %1173 = vmatprep.subr.bf16.mxu1 %v1479_v15  ;;  %1166 = vmatpush3.bf16.msra.mxu0 %v1276_v1 }
 0x266   : > { %1179 = vmatprep.subr.bf16.mxu0 %v1479_v15 }
 0x268   : > { %1174 = vmatpush3.bf16.msra.mxu1 %v1279_v2 }
 0x31b   : > { %v577_v3 = vpop.f32.mrf.mxu1 }
 0x31d   : > { %v1149_v4 = vpop.f32.mrf.mxu1 }
 0x31f   : > { %v580_v5 = vpop.f32.mrf.mxu1  ;;  %v624_v6 = vpop.f32.mrf.mxu0 }
 0x320   : > { %v625_v9 = vadd.f32 %v624_v6, %v577_v3 }
 0x321   : > { %v1150_v7 = vpop.f32.mrf.mxu1  ;;  %v1155_v8 = vpop.f32.mrf.mxu0 }
 0x323   : > { %v627_v10 = vpop.f32.mrf.mxu0  ;;  %v683_v12 = vpop.f32.mrf.mxu1 }
 0x324   : > { %v690_v13 = vadd.f32 %v683_v12, %v625_v9  ;;  %v628_v17 = vadd.f32 %v627_v10, %v580_v5 }
 0x325   : > { %v1156_v14 = vpop.f32.mrf.mxu0  ;;  %v1161_v16 = vpop.f32.mrf.mxu1 }
 0x326   : > { %v698_v18 = vadd.f32 %v1096_v11, %v690_v13 }
 0x327   : > { %v686_v19 = vpop.f32.mrf.mxu1 }
 0x328   : > { %v702_v20 = vmul.f32 0.044715, %v698_v18  ;;  %v691_v21 = vadd.f32 %v686_v19, %v628_v17  ;;  %v700_v35 = vmul.f32 0.5, %v698_v18 }
 0x329   : > { %v1162_v22 = vpop.f32.mrf.mxu1 }
 0x32a   : > { %v704_v23 = vmul.f32 %v702_v20, %v698_v18  ;;  %v699_v24 = vadd.f32 %v1096_v11, %v691_v21 }
 0x32c   : > { %v706_v25 = vmul.f32 %v704_v23, %v698_v18  ;;  %v703_v26 = vmul.f32 0.044715, %v699_v24  ;;  %v701_v38 = vmul.f32 0.5, %v699_v24 }
 0x32e   : > { %v708_v27 = vadd.f32 %v706_v25, %v698_v18  ;;  %v705_v28 = vmul.f32 %v703_v26, %v699_v24 }
 0x330   : > { %v710_v29 = vmul.f32 0.7978846, %v708_v27  ;;  %v707_v30 = vmul.f32 %v705_v28, %v699_v24 }
 0x332   : > { %1285 = vtanh.f32 %v710_v29  ;;  %v709_v31 = vadd.f32 %v707_v30, %v699_v24  ;;  %v951_v24 = vld [vmem:[#allocation8] sm:$0xff]  ;;  %v952_v30 = vld [vmem:[#allocation8 + $0x8] sm:$0xff] }
 0x334   : > { %v711_v32 = vmul.f32 0.7978846, %v709_v31 }
 0x336   : > { %1287 = vtanh.f32 %v711_v32 }
 0x33f   : > { %v1286_v33 = vpop.eup %1285 }
 0x340   : > { %v714_v34 = vadd.f32 1.0, %v1286_v33 }
 0x342   : > { %v716_v37 = vmul.f32 %v714_v34, %v700_v35 }
 0x343   : > { %v1288_v36 = vpop.eup %1287 }
 0x344   : > { %v715_v39 = vadd.f32 1.0, %v1288_v36  ;;  %v719_v43 = vrot.slane %v716_v37, 6  ;;  %v852_v46 = vrot.slane %v716_v37, 2 }
 0x346   : > { %v717_v40 = vmul.f32 %v715_v39, %v701_v38 }
 0x348   : > { %v733_v44 = vpack.c.bf16 %v717_v40, %v716_v37  ;;  %v720_v45 = vrot.slane %v717_v40, 6  ;;  %v853_v48 = vrot.slane %v717_v40, 2 }
 0x34a   : > { %1168 = vmatmul.mubr.msk.bf16.vlgmr.msra.gmra.mxu0 %vm751_vm7, %v733_v44  ;;  %v722_v49 = vsel %vm721_vm8, %v719_v43, %v720_v45  ;;  %v723_v50 = vsel %vm721_vm8, %v720_v45, %v719_v43  ;;  %v856_v51 = vsel %vm854_vm10, %v853_v48, %v852_v46  ;;  %v855_v55 = vsel %vm854_vm10, %v852_v46, %v853_v48 }
 0x34b   : > { %1180 = vmatpush3.bf16.msra.mxu0 %v1278_v42  ;;  %v726_v52 = vsel %vm724_vm9, %v723_v50, 0.0  ;;  %1183 = vmatprep.mubr.msk.bf16.mxu0 %vm1480_vm2, %v1479_v15  ;;  %v860_v56 = vsel %vm858_vm11, %v856_v51, 0.0 }
 0x34c   : > { %1181 = vmatprep.subr.bf16.mxu0 %v1479_v15  ;;  %v728_v54 = vpack.c.bf16 %v722_v49, %v726_v52  ;;  %v861_v47 = vpack.c.bf16 %v860_v56, %v855_v55  ;;  %v1114_v15 = vld [vmem:[%s1802_s8] ss:$0 sm:$0xff] }
 0x34e   : > { %1176 = vmatmul.mubr.msk.bf16.vlgmr.msra.gmra.mxu1 %vm751_vm7, %v728_v54 }
 0x34f   : > { %1182 = vmatpush3.bf16.msra.mxu0 %v1280_v53 }
 0x352   : > { %1184 = vmatmul.mubr.msk.bf16.vlgmr.msra.gmra.mxu0 %vm751_vm7, %v861_v47 }
 0x40a   : > { %v789_v57 = vpop.f32.mrf.mxu0 }
 0x40c   : > { %v1169_v58 = vpop.f32.mrf.mxu0 }
 0x40e   : > { %v792_v59 = vpop.f32.mrf.mxu0  ;;  %v845_v60 = vpop.f32.mrf.mxu1 }
 0x40f   : > { %v846_v63 = vadd.f32 %v845_v60, %v789_v57 }
 0x410   : > { %v1170_v61 = vpop.f32.mrf.mxu0  ;;  %v1177_v62 = vpop.f32.mrf.mxu1 }
 0x412   : > { %v848_v0 = vpop.f32.mrf.mxu1  ;;  %v916_v41 = vpop.f32.mrf.mxu0 }
 0x413   : > { %v923_v1 = vadd.f32 %v916_v41, %v846_v63  ;;  %v849_v4 = vadd.f32 %v848_v0, %v792_v59 }
 0x414   : > { %v1178_v2 = vpop.f32.mrf.mxu1  ;;  %v1185_v3 = vpop.f32.mrf.mxu0 }
 0x415   : > { %v931_v5 = vadd.f32 %v1114_v15, %v923_v1 }
 0x416   : > { %v919_v6 = vpop.f32.mrf.mxu0 }
 0x417   : > { %v935_v7 = vmul.f32 0.044715, %v931_v5  ;;  %v924_v8 = vadd.f32 %v919_v6, %v849_v4  ;;  %v933_v22 = vmul.f32 0.5, %v931_v5 }
 0x418   : > { %v1186_v9 = vpop.f32.mrf.mxu0 }
 0x419   : > { %v937_v10 = vmul.f32 %v935_v7, %v931_v5  ;;  %v932_v11 = vadd.f32 %v1114_v15, %v924_v8 }
 0x41b   : > { %v939_v12 = vmul.f32 %v937_v10, %v931_v5  ;;  %v936_v13 = vmul.f32 0.044715, %v932_v11  ;;  %v934_v28 = vmul.f32 0.5, %v932_v11 }
 0x41d   : > { %v941_v14 = vadd.f32 %v939_v12, %v931_v5  ;;  %v938_v16 = vmul.f32 %v936_v13, %v932_v11 }
 0x41f   : > { %v943_v17 = vmul.f32 0.7978846, %v941_v14  ;;  %v940_v18 = vmul.f32 %v938_v16, %v932_v11 }
 0x421   : > { %1289 = vtanh.f32 %v943_v17  ;;  %v942_v19 = vadd.f32 %v940_v18, %v932_v11 }
 0x423   : > { %v944_v20 = vmul.f32 0.7978846, %v942_v19 }
 0x425   : > { %1291 = vtanh.f32 %v944_v20 }
 0x42e   : > { %v1290_v21 = vpop.eup %1289 }
 0x42f   : > { %v947_v23 = vadd.f32 1.0, %v1290_v21 }
 0x431   : > { %v949_v25 = vmul.f32 %v947_v23, %v933_v22 }
 0x432   : > { %v1292_v26 = vpop.eup %1291 }
 0x433   : > { %v953_v27 = vadd.f32 %v951_v24, %v949_v25  ;;  %v948_v29 = vadd.f32 1.0, %v1292_v26 }
 0x435   : > { %v950_v31 = vmul.f32 %v948_v29, %v934_v28  ;;  %955 = vst.msk [vmem:[%s407_s27] sm:$0xff] %vm751_vm7, %v953_v27 }
 0x437   : > { %v954_v32 = vadd.f32 %v952_v30, %v950_v31 }
 0x439   : > { %956 = vst.msk [vmem:[%s407_s27 + $0x8] sm:$0xff] %vm751_vm7, %v954_v32 }
 0x43a   : > { %1410 = shalt.err (!%p1407_p0)
}
 0x43b   : > { %s1411_s18 = scalar_lea.hbm %s1749_s15, 256  ;;  %s1415_s28 = scalar_lea.hbm %s1804_s10, 512 }
 0x43c   : > { %p1412_p13 = scmp.ne.s32.totalorder %s1749_s15, %s1411_s18  ;;  %p1416_p3 = scmp.lt.s32.totalorder %s1749_s15, %s1804_s10 }
 0x43d   : > { %p1417_p12 = scmp.lt.s32.totalorder %s1415_s28, %s1411_s18 }
 0x43e   : > { %p1413_p9 = pnand %p1412_p13, %p1577_p5 }
 0x43f   : > { %p1418_p10 = por %p1417_p12, %p1416_p3 }
 0x440   : > { %p1414_p1 = pneg %p1413_p9 }
 0x442   : > { %p1419_p2 = pnand %p1418_p10, %p1414_p1 }
 0x444   : > { %1422 = shalt.err (!%p1419_p2)
}
 0x445   : > { %s1482_s21 = smov 128   ;;  %s1483_s30 = smov 8  }
 0x446   : > { %1203 = dma.vmem_to_hbm [thread:$0]  (%p1577_p5), %s1751_s20, 256, %s1749_s15, %s1754_s17, %s1482_s21, %s1482_s21, %s1483_s30  }
 0x447 PF: > { %p1230_p4 = scmp.ge.s32.totalorder %s1469_s16, 2  ;;  %s986_s26 = sand.u32 1, %s1457_s13  }
 0x448   : > { %p1819_p7 = scmp.ne.s32.totalorder %s1810_s24, 0  ;;  %s987_s29 = scalar_lea.sflag [#allocation4], %s986_s26 }
 0x44a   : > { %p1219_p6 = pnand %p1230_p4, %p1819_p7 }
 0x44c   : > { %p1220_p8 = pneg %p1219_p6 }
 0x44e   : > { %1452 = dma.done.wait (%p1220_p8), %s987_s29, 256  }
 0x44f   : > { %1454 = vsyncadd (%p1220_p8), %s987_s29, 4294967040  ;;  %s1820_s11 = sld [smem:[#allocation15_spill]]  ;;  %p23_p11 = scmp.ge.s32.totalorder %s1564_s19, 4  }
 0x450   : > { %s1821_s15 = sld [smem:[#allocation16_spill]]  ;;  %s1822_s13 = smov %s1461_s14 }
 0x451   : > { %s1824_s16 = smov %s1564_s19  ;;  %25 = sbr.rel (!%p23_p11) target bundleno = 6 (0x6), region = 116 }
 0x455   : > { %s1823_s14 = smov %s1820_s11 }
 0x456   :  { %992 = vsyncpa [#allocation3], 1 }
 0x457   :  { %994 = vsyncpa [#allocation3 + $0x1], 1 }
 0x458   :  { %995 = vsyncpa [#allocation6], 1 }
 0x459   :  { %996 = vsyncpa [#allocation9], 1 }
 0x45a   :  { %997 = vsyncpa [#allocation4], 1 }
 0x45b   :  { %999 = vsyncpa [#allocation4 + $0x1], 1 }

</bundles_post_ra>
